<compile_context>
chip_gen: v6e
topology: v6e:2x2x1
jax: 0.10.0
libtpu: 0.0.40
codegen_flags: <defaults>
</compile_context>

<pallas_src>
import math

import jax
import jax.numpy as jnp
from jax.experimental import pallas as pl
from jax.experimental.pallas import tpu as pltpu


_INV_SQRT2 = 1.0 / math.sqrt(2.0)
_SQRT_2_OVER_PI = math.sqrt(2.0 / math.pi)
_TANH_C = 0.044715

_TARGET_TILE_BYTES = 2 * 1024 * 1024   # ~2 MiB blocks -> ~85%+ of HBM roofline
_MIN_TILE_BYTES = 1 * 1024 * 1024      # never split blocks below ~1 MiB
_MIN_PALLAS_ELEMS = 128 * 1024         # below this, fused jnp beats a custom call


# ----------------------------- kernels ------------------------------------ #

def _gelu_tanh_kernel(x_ref, o_ref):
    # tanh-form GELU: 0.5*x*(1 + tanh(sqrt(2/pi)*(x + 0.044715*x^3))).
    # tanh goes to the EUP (its own bundle slot); only ~8 VALU ops remain per
    # vreg, so the kernel stays HBM-bound on v5e/v6e/v7x.
    x = x_ref[...].astype(jnp.float32)
    inner = _SQRT_2_OVER_PI * (x + _TANH_C * x * x * x)
    y = 0.5 * x * (1.0 + jnp.tanh(inner))
    o_ref[...] = y.astype(o_ref.dtype)


def _gelu_erf_kernel(x_ref, o_ref):
    # Exact erf GELU (bit-matching F.gelu default). VALU-heavy (~20+ op erf
    # polynomial): only used when exact_erf=True is requested.
    x = x_ref[...].astype(jnp.float32)
    y = x * 0.5 * (1.0 + jax.lax.erf(x * _INV_SQRT2))
    o_ref[...] = y.astype(o_ref.dtype)


def _gelu_sigmoid_kernel(x_ref, o_ref):
    # Module's approx branch: x * sigmoid(1.702 * x). sigmoid -> EUP.
    # Compute natively for f32/bf16 (bf16 VPU/EUP on v6e/v7x); other dtypes
    # upcast to f32.
    x = x_ref[...]
    if x.dtype not in (jnp.float32, jnp.bfloat16):
        x = x.astype(jnp.float32)
    y = x * jax.nn.sigmoid(1.702 * x)
    o_ref[...] = y.astype(o_ref.dtype)


# --------------------------- plain-jnp fallback ---------------------------- #

def _gelu_jnp(x, use_approx: bool, exact_erf: bool):
    """Fused-XLA GELU, same formula the selected kernel uses."""
    xf = x.astype(jnp.float32)
    if use_approx:
        y = xf * jax.nn.sigmoid(1.702 * xf)
    elif exact_erf:
        y = xf * 0.5 * (1.0 + jax.lax.erf(xf * _INV_SQRT2))
    else:
        inner = _SQRT_2_OVER_PI * (xf + _TANH_C * xf * xf * xf)
        y = 0.5 * xf * (1.0 + jnp.tanh(inner))
    return y.astype(x.dtype)


def _tensorcores_per_chip() -> int:
    """Best-effort: v7x exposes 2 TensorCores per chip; v5e/v6e have 1."""
    try:
        kind = jax.devices()[0].device_kind.lower()
    except Exception:
        return 1
    return 2 if "7" in kind else 1


# ------------------------------- wrapper ----------------------------------- #

def gelu_pallas(x, use_approx: bool = False, exact_erf: bool = False):
    """Elementwise GELU via a Pallas TPU kernel. Works for any input shape."""
    orig_shape = x.shape
    dtype = x.dtype
    n = x.size

    if n == 0:
        return x
    if n < _MIN_PALLAS_ELEMS:
        # Launch + layout plumbing dwarfs one HBM pass; XLA's fused GELU hits
        # the same roofline and can fuse with producers/consumers.
        return _gelu_jnp(x, use_approx, exact_erf)

    itemsize = jnp.dtype(dtype).itemsize
    sub = max(8, 32 // itemsize)  # native sublane count: 8 f32, 16 bf16, 32 int8/fp8

    # Widest lane count (>=128) that tiles n exactly; otherwise use a 128-lane
    # aligned prefix and handle the tiny tail with fused jnp.
    lanes = None
    for c in (1024, 512, 256, 128):
        if n % (sub * c) == 0:
            lanes = c
            break
    if lanes is None:
        lanes = 128
    align = sub * lanes
    n_main = (n // align) * align          # == n when it divides exactly

    x_flat = jnp.ravel(x)
    rows = n_main // lanes
    row_bytes = lanes * itemsize

    # ~2 MiB blocks (2 in + 2 out double buffers ~ 8 MiB VMEM on every gen).
    tr = max(sub, (_TARGET_TILE_BYTES // row_bytes) // sub * sub)
    tr = min(tr, rows)

    # Only on multi-TC chips (v7x): target >= 4 grid steps (>= 2 per core, so
    # each core still pipelines) while keeping blocks >= ~1 MiB.  Single-TC
    # chips (v5e/v6e) keep the largest block — no self-inflicted split.
    if _tensorcores_per_chip() >= 2:
        min_rows = max(sub, (_MIN_TILE_BYTES // row_bytes) // sub * sub)
        quarter = max(sub, pl.cdiv(pl.cdiv(rows, 4), sub) * sub)
        tr = min(tr, max(quarter, min_rows))
        tr = min(tr, rows)

    grid = pl.cdiv(rows, tr)   # ragged last block is masked by Pallas

    if use_approx:
        kernel = _gelu_sigmoid_kernel
    elif exact_erf:
        kernel = _gelu_erf_kernel
    else:
        kernel = _gelu_tanh_kernel

    x_main = x_flat if n_main == n else x_flat[:n_main]
    x2d = x_main.reshape(rows, lanes)

    out2d = pl.pallas_call(
        kernel,
        out_shape=jax.ShapeDtypeStruct((rows, lanes), dtype),
        grid_spec=pltpu.PrefetchScalarGridSpec(
            num_scalar_prefetch=0,
            grid=(grid,),
            in_specs=[pl.BlockSpec((tr, lanes), lambda i: (i, 0))],
            out_specs=pl.BlockSpec((tr, lanes), lambda i: (i, 0)),
        ),
        compiler_params=pltpu.CompilerParams(
            dimension_semantics=("parallel",),
            vmem_limit_bytes=32 * 1024 * 1024,
        ),
        # NOTE: no input_output_aliases — without caller-side donation XLA
        # would insert a defensive full copy of the input (extra HBM pass).
    )(x2d)

    out_flat = out2d.reshape(-1)
    if n_main != n:
        # Ragged tail (< sub*lanes elements): fused jnp, then stitch.
        # TODO(synk): a scalar-prefetched length + masked final block would
        # also avoid the concat copy; not worth it for the rare ragged case.
        tail = _gelu_jnp(x_flat[n_main:], use_approx, exact_erf)
        out_flat = jnp.concatenate([out_flat, tail])
    return out_flat.reshape(orig_shape)


class GELU:
    """JAX/Pallas mirror of the PyTorch GELU module.

    use_approx=True  -> x * sigmoid(1.702 * x)
    use_approx=False -> GELU (tanh form by default; exact_erf=True for the
                        bit-matching erf formulation of F.gelu).
    """

    def __init__(self, use_approx: bool = False, exact_erf: bool = False):
        self.use_approx = use_approx
        self.exact_erf = exact_erf

    def __call__(self, x):
        return gelu_pallas(x, use_approx=self.use_approx, exact_erf=self.exact_erf)


# -------------------------------- tests ------------------------------------ #

if __name__ == "__main__":
    key = jax.random.PRNGKey(0)
    k1, k2, k3, k4 = jax.random.split(key, 4)

    gelu_default = GELU(use_approx=False)               # tanh-form fast path
    gelu_exact = GELU(use_approx=False, exact_erf=True)  # bit-matching F.gelu
    gelu_approx = GELU(use_approx=True)                  # sigmoid branch

    def erf_ref(x):
        xf = x.astype(jnp.float32)
        return (xf * 0.5 * (1.0 + jax.lax.erf(xf * _INV_SQRT2))).astype(x.dtype)

    def sig_ref(x):
        xf = x.astype(jnp.float32)
        return (xf * jax.nn.sigmoid(1.702 * xf)).astype(x.dtype)

    # 1) Transformer-activation-sized f32 input (batch=2, seq=64, hidden=1024):
    #    exercises the Pallas tanh kernel and the exact-erf kernel.
    x1 = jax.random.normal(k1, (2, 64, 1024), dtype=jnp.float32)
    y1 = jax.block_until_ready(gelu_default(x1))
    assert y1.shape == x1.shape and y1.dtype == x1.dtype
    assert jnp.allclose(y1, erf_ref(x1), atol=2e-3, rtol=0)           # tanh vs erf GELU
    assert jnp.allclose(y1, _gelu_jnp(x1, False, False), atol=1e-4, rtol=1e-4)
    y1e = jax.block_until_ready(gelu_exact(x1))
    assert jnp.allclose(y1e, erf_ref(x1), atol=1e-5, rtol=1e-5)

    # 2) bf16 input: 1024-lane slab, native-bf16 sigmoid kernel.
    x2 = jax.random.normal(k2, (2, 256, 1024), dtype=jnp.bfloat16)
    y2 = jax.block_until_ready(gelu_approx(x2))
    assert y2.shape == x2.shape and y2.dtype == x2.dtype
    assert jnp.allclose(y2.astype(jnp.float32), sig_ref(x2).astype(jnp.float32),
                        atol=2e-2, rtol=2e-2)

    # 3) Ragged size: aligned-prefix Pallas kernel + fused-jnp tail.
    x3 = jax.random.normal(k3, (2, 77, 933), dtype=jnp.float32)
    y3 = jax.block_until_ready(gelu_approx(x3))
    assert y3.shape == x3.shape and y3.dtype == x3.dtype
    assert jnp.allclose(y3, sig_ref(x3), atol=1e-5, rtol=1e-5)

    # 4) Tiny NCHW-like input (as used inside the stage2 model): fused-jnp
    #    fallback path (below the Pallas threshold by design).
    x4 = jax.random.normal(k4, (2, 4, 16, 16), dtype=jnp.float32)
    y4 = jax.block_until_ready(gelu_default(x4))
    y4a = jax.block_until_ready(gelu_approx(x4))
    assert y4.shape == x4.shape and y4.dtype == x4.dtype
    assert jnp.allclose(y4a, sig_ref(x4), atol=1e-5, rtol=1e-5)
    assert jnp.allclose(y4, erf_ref(x4), atol=2e-3, rtol=0)

    print("KERNEL_OK")
</pallas_src>

<mosaic_0001>
module attributes {stable_mosaic.version = 11 : i64} {
  func.func @_gelu_tanh_kernel(%arg0: i32, %arg1: memref<128x1024xf32, #tpu.memory_space<vmem>>, %arg2: memref<128x1024xf32, #tpu.memory_space<vmem>>) attributes {dimension_semantics = [#tpu.dimension_semantics<parallel>], iteration_bounds = array<i64: 1>, scalar_prefetch = 0 : i64, scratch_operands = 0 : i64, tpu.core_type = #tpu.core_type<tc>, window_params = [{transform_indices = @transform_0, window_bounds = array<i64: 128, 1024>}, {transform_indices = @transform_1, window_bounds = array<i64: 128, 1024>}]} {
    %c0 = arith.constant 0 : index
    %c0_0 = arith.constant 0 : index
    %0 = vector.load %arg1[%c0, %c0_0] : memref<128x1024xf32, #tpu.memory_space<vmem>>, vector<128x1024xf32>
    %cst = arith.constant 4.471500e-02 : f32
    %1 = vector.broadcast %cst : f32 to vector<128x1024xf32>
    %2 = arith.mulf %1, %0 : vector<128x1024xf32>
    %3 = arith.mulf %2, %0 : vector<128x1024xf32>
    %4 = arith.mulf %3, %0 : vector<128x1024xf32>
    %5 = arith.addf %0, %4 : vector<128x1024xf32>
    %cst_1 = arith.constant 0.797884583 : f32
    %6 = vector.broadcast %cst_1 : f32 to vector<128x1024xf32>
    %7 = arith.mulf %6, %5 : vector<128x1024xf32>
    %cst_2 = arith.constant 5.000000e-01 : f32
    %8 = vector.broadcast %cst_2 : f32 to vector<128x1024xf32>
    %9 = arith.mulf %8, %0 : vector<128x1024xf32>
    %10 = math.tanh %7 : vector<128x1024xf32>
    %cst_3 = arith.constant 1.000000e+00 : f32
    %11 = vector.broadcast %cst_3 : f32 to vector<128x1024xf32>
    %12 = arith.addf %11, %10 : vector<128x1024xf32>
    %13 = arith.mulf %9, %12 : vector<128x1024xf32>
    %c0_4 = arith.constant 0 : index
    %c0_5 = arith.constant 0 : index
    %14 = vector.load %arg2[%c0_4, %c0_5] : memref<128x1024xf32, #tpu.memory_space<vmem>>, vector<128x1024xf32>
    tpu.vector_store %arg2[%c0_4, %c0_5], %13 {strides = array<i32>} : memref<128x1024xf32, #tpu.memory_space<vmem>>, vector<128x1024xf32>,
    return
  }
  func.func @transform_0(%arg0: i32) -> (i32, i32) {
    %c0_i32 = arith.constant 0 : i32
    %c0_i32_0 = arith.constant 0 : i32
    return %arg0, %c0_i32 : i32, i32
  }
  func.func @transform_1(%arg0: i32) -> (i32, i32) {
    %c0_i32 = arith.constant 0 : i32
    %c0_i32_0 = arith.constant 0 : i32
    return %arg0, %c0_i32 : i32, i32
  }
}

</mosaic_0001>

<bundles_post_ra>
// kernel: tpu_custom_call.1
= control target key start
LH: loop header
LB: loop body
LE: loop exit
PB: predicated region body
PF: predicated region fallthrough
CT: control target
= control target key end

     0   :  { %6 = vsyncpa [#allocation3], 0  ;;  %s2671_s0 = inlined_call_operand.hbm [shape: f32[128,1024], index: 0, kind: input, shape index: {}]   ;;  %s2672_s1 = inlined_call_operand.hbm [shape: f32[128,1024], index: 1, kind: output, shape index: {}]  }
   0x1   :  { %7 = vsyncpa [#allocation4], 0  ;;  %s1752_s6 = smov [#allocation2]  }
   0x2   :  { %s13_s7 = sshll.u32 %s1752_s6, 4  ;;  %s14_s7 = int_to_ptr.vmem [resolvable:$true] %s13_s7 }
   0x3   :  { %s1716_s8 = scalar_lea.vmem %s14_s7, 16384  ;;  %p1721_p1 = scmp.lt.s32.totalorder %s14_s7, %s14_s7 }
   0x4   :  { %p1717_p0 = scmp.ne.s32.totalorder %s14_s7, %s1716_s8  ;;  %p1722_p2 = scmp.lt.s32.totalorder %s1716_s8, %s1716_s8 }
   0x6   :  { %p1723_p3 = por %p1722_p2, %p1721_p1 }
   0x8   :  { %p1724_p4 = pnand %p1723_p3, %p1717_p0 }
   0xa   :  { %1727 = shalt.err (!%p1724_p4)
}
   0xb   :  { %s1753_s9 = smov 1024   ;;  %s1754_s10 = smov 64  }
   0xc   :  { %19 = dma.hbm_to_vmem [thread:$0]  %s2671_s0, 16384, %s14_s7, [#allocation3], %s1753_s9, %s1753_s9, %s1754_s10  }
   0xd   :  { %1748 = dma.done.wait [#allocation3], 16384  }
   0xe   :  { %1749 = vsyncadd [#allocation3], 4294950912  ;;  %v23_v0 = vld [vmem:[#allocation2] sm:$0xff]  ;;  %v24_v1 = vld [vmem:[#allocation2 + $0x8] sm:$0xff]  ;;  %s1755_s0 = smov [#allocation5]  }
   0xf   :  { %v25_v2 = vld [vmem:[#allocation2 + $0x10] sm:$0xff]  ;;  %v151_v3 = vmul.f32 0.044715, %v23_v0  ;;  %v152_v4 = vmul.f32 0.044715, %v24_v1  ;;  %v26_v6 = vld [vmem:[#allocation2 + $0x18] sm:$0xff] }
  0x10   :  { %v153_v5 = vmul.f32 0.044715, %v25_v2  ;;  %v27_v7 = vld [vmem:[#allocation2 + $0x20] sm:$0xff]  ;;  %v1772_v8 = vld [vmem:[#allocation2 + $0x28] sm:$0xff]  ;;  %v154_v11 = vmul.f32 0.044715, %v26_v6 }
  0x11   :  { %v279_v9 = vmul.f32 %v151_v3, %v23_v0  ;;  %v280_v10 = vmul.f32 %v152_v4, %v24_v1  ;;  %v1774_v12 = vld [vmem:[#allocation2 + $0x30] sm:$0xff]  ;;  %v155_v14 = vmul.f32 0.044715, %v27_v7  ;;  %v156_v15 = vmul.f32 0.044715, %v1772_v8  ;;  %v1779_v23 = vld [vmem:[#allocation2 + $0x38] sm:$0xff] }
  0x12   :  { %v281_v13 = vmul.f32 %v153_v5, %v25_v2  ;;  %v282_v18 = vmul.f32 %v154_v11, %v26_v6  ;;  %v157_v22 = vmul.f32 0.044715, %v1774_v12  ;;  %v1781_v25 = vmul.f32 0.5, %v23_v0  ;;  %v31_v40 = vld [vmem:[#allocation2 + $0x40] sm:$0xff]  ;;  %v1791_v44 = vld [vmem:[#allocation2 + $0x48] sm:$0xff]  ;;  %v1794_v48 = vld [vmem:[#allocation2 + $0x50] sm:$0xff] }
  0x13   :  { %v407_v16 = vmul.f32 %v279_v9, %v23_v0  ;;  %v408_v17 = vmul.f32 %v280_v10, %v24_v1  ;;  %v283_v20 = vmul.f32 %v155_v14, %v27_v7  ;;  %v284_v21 = vmul.f32 %v156_v15, %v1772_v8  ;;  %v1799_v52 = vld [vmem:[#allocation2 + $0x58] sm:$0xff]  ;;  %v1806_v59 = vld [vmem:[#allocation2 + $0x60] sm:$0xff]  ;;  %s1436_s13 = sshll.u32 %s1755_s0, 4  ;;  %s1437_s13 = int_to_ptr.vmem [resolvable:$true] %s1436_s13 }
  0x14   :  { %v409_v19 = vmul.f32 %v281_v13, %v25_v2  ;;  %v410_v27 = vmul.f32 %v282_v18, %v26_v6  ;;  %v285_v31 = vmul.f32 %v157_v22, %v1774_v12  ;;  %v158_v35 = vmul.f32 0.044715, %v1779_v23  ;;  %s1728_s14 = scalar_lea.vmem %s1437_s13, 16384  ;;  %p1733_p6 = scmp.lt.s32.totalorder %s1437_s13, %s1437_s13 }
  0x15   :  { %v535_v24 = vadd.f32 %v407_v16, %v23_v0  ;;  %v536_v26 = vadd.f32 %v408_v17, %v24_v1  ;;  %v411_v29 = vmul.f32 %v283_v20, %v27_v7  ;;  %v412_v30 = vmul.f32 %v284_v21, %v1772_v8  ;;  %p1729_p5 = scmp.ne.s32.totalorder %s1437_s13, %s1728_s14  ;;  %p1734_p7 = scmp.lt.s32.totalorder %s1728_s14, %s1728_s14 }
  0x16   :  { %v537_v28 = vadd.f32 %v409_v19, %v25_v2  ;;  %v538_v34 = vadd.f32 %v410_v27, %v26_v6  ;;  %v413_v39 = vmul.f32 %v285_v31, %v1774_v12  ;;  %v1788_v41 = vmul.f32 0.5, %v24_v1 }
  0x17   :  { %v663_v32 = vmul.f32 0.7978846, %v535_v24  ;;  %v664_v33 = vmul.f32 0.7978846, %v536_v26  ;;  %v539_v37 = vadd.f32 %v411_v29, %v27_v7  ;;  %v540_v38 = vadd.f32 %v412_v30, %v1772_v8  ;;  %v1839_v24 = vld [vmem:[#allocation2 + $0x78] sm:$0xff]  ;;  %p1735_p8 = por %p1734_p7, %p1733_p6 }
  0x18   :  { %v665_v36 = vmul.f32 0.7978846, %v537_v28  ;;  %v666_v42 = vmul.f32 0.7978846, %v538_v34  ;;  %v286_v43 = vmul.f32 %v158_v35, %v1779_v23  ;;  %v541_v47 = vadd.f32 %v413_v39, %v1774_v12 }
  0x19   :  { %1452 = vtanh.f32 %v663_v32  ;;  %v667_v45 = vmul.f32 0.7978846, %v539_v37  ;;  %v668_v46 = vmul.f32 0.7978846, %v540_v38  ;;  %v1796_v49 = vmul.f32 0.5, %v25_v2  ;;  %v1813_v2 = vld [vmem:[#allocation2 + $0x68] sm:$0xff]  ;;  %p1736_p9 = pnand %p1735_p8, %p1729_p5 }
  0x1a   :  { %1454 = vtanh.f32 %v664_v33  ;;  %v414_v50 = vmul.f32 %v286_v43, %v1779_v23  ;;  %v159_v51 = vmul.f32 0.044715, %v31_v40  ;;  %v1801_v53 = vmul.f32 0.5, %v26_v6 }
  0x1b   :  { %1456 = vtanh.f32 %v665_v36  ;;  %v669_v54 = vmul.f32 0.7978846, %v541_v47  ;;  %v160_v55 = vmul.f32 0.044715, %v1791_v44  ;;  %v161_v58 = vmul.f32 0.044715, %v1794_v48 }
  0x1c   :  { %1458 = vtanh.f32 %v666_v42  ;;  %v542_v56 = vadd.f32 %v414_v50, %v1779_v23  ;;  %v287_v57 = vmul.f32 %v159_v51, %v31_v40  ;;  %v1808_v60 = vmul.f32 0.5, %v27_v7  ;;  %v1821_v7 = vld [vmem:[#allocation2 + $0x70] sm:$0xff] }
  0x1d   :  { %1460 = vtanh.f32 %v667_v45  ;;  %v288_v61 = vmul.f32 %v160_v55, %v1791_v44  ;;  %v162_v62 = vmul.f32 0.044715, %v1799_v52  ;;  %v289_v1 = vmul.f32 %v161_v58, %v1794_v48 }
  0x1e   :  { %1462 = vtanh.f32 %v668_v46  ;;  %v670_v63 = vmul.f32 0.7978846, %v542_v56  ;;  %v415_v0 = vmul.f32 %v287_v57, %v31_v40  ;;  %v1816_v3 = vmul.f32 0.5, %v1772_v8 }
  0x1f   :  { %1464 = vtanh.f32 %v669_v54  ;;  %v416_v4 = vmul.f32 %v288_v61, %v1791_v44  ;;  %v290_v5 = vmul.f32 %v162_v62, %v1799_v52  ;;  %v163_v6 = vmul.f32 0.044715, %v1806_v59  ;;  %v1857_v62 = vld [vmem:[#allocation2 + $0x88] sm:$0xff] }
  0x20   :  { %v1824_v9 = vmul.f32 0.5, %v1774_v12  ;;  %1466 = vtanh.f32 %v670_v63  ;;  %v543_v10 = vadd.f32 %v415_v0, %v31_v40  ;;  %v417_v11 = vmul.f32 %v289_v1, %v1794_v48 }
  0x21   :  { %v544_v13 = vadd.f32 %v416_v4, %v1791_v44  ;;  %v418_v8 = vmul.f32 %v290_v5, %v1799_v52  ;;  %v291_v14 = vmul.f32 %v163_v6, %v1806_v59  ;;  %v164_v15 = vmul.f32 0.044715, %v1813_v2  ;;  %v1863_v6 = vld [vmem:[#allocation2 + $0x90] sm:$0xff] }
  0x22   :  { %v1832_v16 = vmul.f32 0.5, %v1779_v23  ;;  %v671_v17 = vmul.f32 0.7978846, %v543_v10  ;;  %v545_v18 = vadd.f32 %v417_v11, %v1794_v48  ;;  %v165_v12 = vmul.f32 0.044715, %v1821_v7 }
  0x23   :  { %v672_v19 = vmul.f32 0.7978846, %v544_v13  ;;  %v546_v20 = vadd.f32 %v418_v8, %v1799_v52  ;;  %v419_v21 = vmul.f32 %v291_v14, %v1806_v59  ;;  %v292_v22 = vmul.f32 %v164_v15, %v1813_v2  ;;  %v1869_v8 = vld [vmem:[#allocation2 + $0x98] sm:$0xff] }
  0x24   :  { %v1841_v26 = vmul.f32 0.5, %v31_v40  ;;  %1468 = vtanh.f32 %v671_v17  ;;  %v673_v27 = vmul.f32 0.7978846, %v545_v18  ;;  %v293_v23 = vmul.f32 %v165_v12, %v1821_v7  ;;  %v1873_v18 = vld [vmem:[#allocation2 + $0xa0] sm:$0xff] }
  0x25   :  { %1470 = vtanh.f32 %v672_v19  ;;  %v674_v29 = vmul.f32 0.7978846, %v546_v20  ;;  %v547_v30 = vadd.f32 %v419_v21, %v1806_v59  ;;  %v420_v31 = vmul.f32 %v292_v22, %v1813_v2  ;;  %v1879_v20 = vld [vmem:[#allocation2 + $0xa8] sm:$0xff] }
  0x26   :  { %v1453_v28 = vpop.eup %1452  ;;  %1472 = vtanh.f32 %v673_v27  ;;  %v421_v34 = vmul.f32 %v293_v23, %v1821_v7  ;;  %v166_v35 = vmul.f32 0.044715, %v1839_v24  ;;  %v800_v1 = vmul.f32 0.5, %v1791_v44 }
  0x27   :  { %v1455_v32 = vpop.eup %1454  ;;  %v1047_v33 = vadd.f32 1.0, %v1453_v28  ;;  %1474 = vtanh.f32 %v674_v29  ;;  %v675_v38 = vmul.f32 0.7978846, %v547_v30  ;;  %v548_v39 = vadd.f32 %v420_v31, %v1813_v2 }
  0x28   :  { %v1457_v36 = vpop.eup %1456  ;;  %v1048_v37 = vadd.f32 1.0, %v1455_v32  ;;  %v549_v45 = vadd.f32 %v421_v34, %v1821_v7  ;;  %v294_v46 = vmul.f32 %v166_v35, %v1839_v24  ;;  %v801_v13 = vmul.f32 0.5, %v1794_v48 }
  0x29   :  { %v1459_v40 = vpop.eup %1458  ;;  %v1175_v42 = vmul.f32 %v1047_v33, %v1781_v25  ;;  %v1049_v43 = vadd.f32 1.0, %v1457_v36  ;;  %1476 = vtanh.f32 %v675_v38  ;;  %v676_v54 = vmul.f32 0.7978846, %v548_v39  ;;  %v1855_v25 = vld [vmem:[#allocation2 + $0x80] sm:$0xff] }
  0x2a   :  { %v1461_v47 = vpop.eup %1460  ;;  %v1176_v50 = vmul.f32 %v1048_v37, %v1788_v41  ;;  %v1050_v51 = vadd.f32 1.0, %v1459_v40  ;;  %v677_v58 = vmul.f32 0.7978846, %v549_v45  ;;  %v422_v61 = vmul.f32 %v294_v46, %v1839_v24 }
  0x2b   :  { %v1463_v55 = vpop.eup %1462  ;;  %1303 = vst [vmem:[#allocation5] sm:$0xff] %v1175_v42  ;;  %v1177_v56 = vmul.f32 %v1049_v43, %v1796_v49  ;;  %v1051_v57 = vadd.f32 1.0, %v1461_v47  ;;  %1478 = vtanh.f32 %v676_v54  ;;  %v168_v44 = vmul.f32 0.044715, %v1857_v62 }
  0x2c   :  { %v1465_v63 = vpop.eup %1464  ;;  %1304 = vst [vmem:[#allocation5 + $0x8] sm:$0xff] %v1176_v50  ;;  %v1178_v0 = vmul.f32 %v1050_v51, %v1801_v53  ;;  %v1052_v41 = vadd.f32 1.0, %v1463_v55  ;;  %1480 = vtanh.f32 %v677_v58  ;;  %v550_v5 = vadd.f32 %v422_v61, %v1839_v24  ;;  %v1901_v58 = vld [vmem:[#allocation2 + $0xb0] sm:$0xff] }
  0x2d   :  { %1305 = vst [vmem:[#allocation5 + $0x10] sm:$0xff] %v1177_v56  ;;  %v1179_v4 = vmul.f32 %v1051_v57, %v1808_v60  ;;  %v1053_v49 = vadd.f32 1.0, %v1465_v63  ;;  %v1467_v10 = vpop.eup %1466  ;;  %v167_v53 = vmul.f32 0.044715, %v1855_v25  ;;  %v802_v15 = vmul.f32 0.5, %v1799_v52 }
  0x2e   :  { %1306 = vst [vmem:[#allocation5 + $0x18] sm:$0xff] %v1178_v0  ;;  %v1180_v11 = vmul.f32 %v1052_v41, %v1816_v3  ;;  %v1054_v14 = vadd.f32 1.0, %v1467_v10  ;;  %v678_v17 = vmul.f32 0.7978846, %v550_v5  ;;  %v803_v3 = vmul.f32 0.5, %v1806_v59  ;;  %v1905_v10 = vld [vmem:[#allocation2 + $0xb8] sm:$0xff] }
  0x2f   :  { %1307 = vst [vmem:[#allocation5 + $0x20] sm:$0xff] %v1179_v4  ;;  %v1181_v60 = vmul.f32 %v1053_v49, %v1824_v9  ;;  %v295_v48 = vmul.f32 %v167_v53, %v1855_v25  ;;  %v296_v12 = vmul.f32 %v168_v44, %v1857_v62  ;;  %v169_v19 = vmul.f32 0.044715, %v1863_v6  ;;  %v1908_v44 = vld [vmem:[#allocation2 + $0xc0] sm:$0xff] }
  0x30   :  { %1308 = vst [vmem:[#allocation5 + $0x28] sm:$0xff] %v1180_v11  ;;  %v1182_v9 = vmul.f32 %v1054_v14, %v1832_v16  ;;  %v804_v21 = vmul.f32 0.5, %v1813_v2  ;;  %1482 = vtanh.f32 %v678_v17  ;;  %v170_v52 = vmul.f32 0.044715, %v1869_v8  ;;  %v1912_v17 = vld [vmem:[#allocation2 + $0xc8] sm:$0xff] }
  0x31   :  { %1309 = vst [vmem:[#allocation5 + $0x30] sm:$0xff] %v1181_v60  ;;  %v1469_v22 = vpop.eup %1468  ;;  %v423_v27 = vmul.f32 %v295_v48, %v1855_v25  ;;  %v424_v59 = vmul.f32 %v296_v12, %v1857_v62  ;;  %v297_v23 = vmul.f32 %v169_v19, %v1863_v6  ;;  %v171_v28 = vmul.f32 0.044715, %v1873_v18  ;;  %v1916_v19 = vld [vmem:[#allocation2 + $0xd0] sm:$0xff] }
  0x32   :  { %v1471_v29 = vpop.eup %1470  ;;  %1310 = vst [vmem:[#allocation5 + $0x38] sm:$0xff] %v1182_v9  ;;  %v1055_v30 = vadd.f32 1.0, %v1469_v22  ;;  %v805_v31 = vmul.f32 0.5, %v1821_v7  ;;  %v298_v16 = vmul.f32 %v170_v52, %v1869_v8  ;;  %v172_v2 = vmul.f32 0.044715, %v1879_v20 }
  0x33   :  { %v1473_v32 = vpop.eup %1472  ;;  %v1056_v33 = vadd.f32 1.0, %v1471_v29  ;;  %v551_v34 = vadd.f32 %v423_v27, %v1855_v25  ;;  %v552_v35 = vadd.f32 %v424_v59, %v1857_v62  ;;  %v425_v36 = vmul.f32 %v297_v23, %v1863_v6  ;;  %v1924_v29 = vld [vmem:[#allocation2 + $0xd8] sm:$0xff] }
  0x34   :  { %v1475_v37 = vpop.eup %1474  ;;  %v1183_v38 = vmul.f32 %v1055_v30, %v1841_v26  ;;  %v1057_v39 = vadd.f32 1.0, %v1473_v32  ;;  %v426_v40 = vmul.f32 %v298_v16, %v1869_v8  ;;  %v299_v7 = vmul.f32 %v171_v28, %v1873_v18 }
  0x35   :  { %v1184_v42 = vmul.f32 %v1056_v33, %v800_v1  ;;  %v1058_v43 = vadd.f32 1.0, %v1475_v37  ;;  %v679_v45 = vmul.f32 0.7978846, %v551_v34  ;;  %v680_v46 = vmul.f32 0.7978846, %v552_v35  ;;  %v1932_v33 = vld [vmem:[#allocation2 + $0xe0] sm:$0xff] }
  0x36   :  { %v1477_v47 = vpop.eup %1476  ;;  %1311 = vst [vmem:[#allocation5 + $0x40] sm:$0xff] %v1183_v38  ;;  %v1185_v50 = vmul.f32 %v1057_v39, %v801_v13  ;;  %v553_v51 = vadd.f32 %v425_v36, %v1863_v6  ;;  %v554_v54 = vadd.f32 %v426_v40, %v1869_v8  ;;  %v427_v55 = vmul.f32 %v299_v7, %v1873_v18 }
  0x37   :  { %1312 = vst [vmem:[#allocation5 + $0x48] sm:$0xff] %v1184_v42  ;;  %v1186_v26 = vmul.f32 %v1058_v43, %v802_v15  ;;  %v1059_v56 = vadd.f32 1.0, %v1477_v47  ;;  %1484 = vtanh.f32 %v679_v45  ;;  %v300_v57 = vmul.f32 %v172_v2, %v1879_v20 }
  0x38   :  { %v1479_v61 = vpop.eup %1478  ;;  %1313 = vst [vmem:[#allocation5 + $0x50] sm:$0xff] %v1185_v50  ;;  %1486 = vtanh.f32 %v680_v46  ;;  %v681_v63 = vmul.f32 0.7978846, %v553_v51  ;;  %v682_v0 = vmul.f32 0.7978846, %v554_v54  ;;  %v555_v41 = vadd.f32 %v427_v55, %v1873_v18 }
  0x39   :  { %v1481_v1 = vpop.eup %1480  ;;  %1314 = vst [vmem:[#allocation5 + $0x58] sm:$0xff] %v1186_v26  ;;  %v1187_v4 = vmul.f32 %v1059_v56, %v803_v3  ;;  %v1060_v49 = vadd.f32 1.0, %v1479_v61  ;;  %v428_v5 = vmul.f32 %v300_v57, %v1879_v20  ;;  %v173_v53 = vmul.f32 0.044715, %v1901_v58 }
  0x3a   :  { %v1061_v11 = vadd.f32 1.0, %v1481_v1  ;;  %1488 = vtanh.f32 %v681_v63  ;;  %v683_v13 = vmul.f32 0.7978846, %v555_v41  ;;  %v806_v14 = vmul.f32 0.5, %v1839_v24  ;;  %v1950_v63 = vld [vmem:[#allocation2 + $0xe8] sm:$0xff] }
  0x3b   :  { %1315 = vst [vmem:[#allocation5 + $0x60] sm:$0xff] %v1187_v4  ;;  %v1188_v60 = vmul.f32 %v1060_v49, %v804_v21  ;;  %1490 = vtanh.f32 %v682_v0  ;;  %v556_v15 = vadd.f32 %v428_v5, %v1879_v20  ;;  %v301_v48 = vmul.f32 %v173_v53, %v1901_v58 }
  0x3c   :  { %v1189_v3 = vmul.f32 %v1061_v11, %v805_v31  ;;  %1492 = vtanh.f32 %v683_v13  ;;  %v174_v12 = vmul.f32 0.044715, %v1905_v10  ;;  %v807_v52 = vmul.f32 0.5, %v1855_v25  ;;  %v1954_v13 = vld [vmem:[#allocation2 + $0xf0] sm:$0xff] }
  0x3d   :  { %v1483_v9 = vpop.eup %1482  ;;  %1316 = vst [vmem:[#allocation5 + $0x68] sm:$0xff] %v1188_v60  ;;  %v808_v21 = vmul.f32 0.5, %v1857_v62  ;;  %v684_v24 = vmul.f32 0.7978846, %v556_v15  ;;  %v175_v22 = vmul.f32 0.044715, %v1908_v44  ;;  %v429_v59 = vmul.f32 %v301_v48, %v1901_v58 }
  0x3e   :  { %1317 = vst [vmem:[#allocation5 + $0x70] sm:$0xff] %v1189_v3  ;;  %v1062_v27 = vadd.f32 1.0, %v1483_v9  ;;  %v302_v23 = vmul.f32 %v174_v12, %v1905_v10  ;;  %v176_v28 = vmul.f32 0.044715, %v1912_v17  ;;  %v809_v30 = vmul.f32 0.5, %v1863_v6  ;;  %v1957_v3 = vld [vmem:[#allocation2 + $0xf8] sm:$0xff] }
  0x3f   :  { %1494 = vtanh.f32 %v684_v24  ;;  %v303_v25 = vmul.f32 %v175_v22, %v1908_v44  ;;  %v177_v62 = vmul.f32 0.044715, %v1916_v19  ;;  %v557_v16 = vadd.f32 %v429_v59, %v1901_v58 }
  0x40   :  { %v1190_v31 = vmul.f32 %v1062_v27, %v806_v14  ;;  %v430_v2 = vmul.f32 %v302_v23, %v1905_v10  ;;  %v304_v32 = vmul.f32 %v176_v28, %v1912_v17  ;;  %v810_v34 = vmul.f32 0.5, %v1869_v8  ;;  %v1963_v27 = vld [vmem:[#allocation2 + $0x100] sm:$0xff] }
  0x41   :  { %v431_v35 = vmul.f32 %v303_v25, %v1908_v44  ;;  %v305_v6 = vmul.f32 %v177_v62, %v1916_v19  ;;  %v178_v36 = vmul.f32 0.044715, %v1924_v29  ;;  %v811_v37 = vmul.f32 0.5, %v1873_v18  ;;  %v1967_v62 = vld [vmem:[#allocation2 + $0x108] sm:$0xff] }
  0x42   :  { %1318 = vst [vmem:[#allocation5 + $0x78] sm:$0xff] %v1190_v31  ;;  %v685_v38 = vmul.f32 0.7978846, %v557_v16  ;;  %v558_v39 = vadd.f32 %v430_v2, %v1905_v10  ;;  %v432_v40 = vmul.f32 %v304_v32, %v1912_v17  ;;  %v179_v43 = vmul.f32 0.044715, %v1932_v33  ;;  %v1972_v32 = vld [vmem:[#allocation2 + $0x110] sm:$0xff] }
  0x43   :  { %v559_v7 = vadd.f32 %v431_v35, %v1908_v44  ;;  %v433_v42 = vmul.f32 %v305_v6, %v1916_v19  ;;  %v306_v8 = vmul.f32 %v178_v36, %v1924_v29  ;;  %v812_v46 = vmul.f32 0.5, %v1879_v20 }
  0x44   :  { %v1485_v45 = vpop.eup %1484  ;;  %1496 = vtanh.f32 %v685_v38  ;;  %v686_v47 = vmul.f32 0.7978846, %v558_v39  ;;  %v560_v18 = vadd.f32 %v432_v40, %v1912_v17  ;;  %v307_v61 = vmul.f32 %v179_v43, %v1932_v33 }
  0x45   :  { %v1487_v50 = vpop.eup %1486  ;;  %v1063_v51 = vadd.f32 1.0, %v1485_v45  ;;  %v687_v54 = vmul.f32 0.7978846, %v559_v7  ;;  %v561_v55 = vadd.f32 %v433_v42, %v1916_v19  ;;  %v434_v26 = vmul.f32 %v306_v8, %v1924_v29  ;;  %v1984_v7 = vld [vmem:[#allocation2 + $0x118] sm:$0xff] }
  0x46   :  { %v1064_v56 = vadd.f32 1.0, %v1487_v50  ;;  %1498 = vtanh.f32 %v686_v47  ;;  %v688_v57 = vmul.f32 0.7978846, %v560_v18  ;;  %v435_v11 = vmul.f32 %v307_v61, %v1932_v33 }
  0x47   :  { %v1489_v0 = vpop.eup %1488  ;;  %v1191_v20 = vmul.f32 %v1063_v51, %v807_v52  ;;  %1500 = vtanh.f32 %v687_v54  ;;  %v689_v41 = vmul.f32 0.7978846, %v561_v55  ;;  %v562_v1 = vadd.f32 %v434_v26, %v1924_v29 }
  0x48   :  { %v1491_v4 = vpop.eup %1490  ;;  %v1192_v49 = vmul.f32 %v1064_v56, %v808_v21  ;;  %v1065_v5 = vadd.f32 1.0, %v1489_v0  ;;  %1502 = vtanh.f32 %v688_v57  ;;  %v180_v15 = vmul.f32 0.044715, %v1950_v63 }
  0x49   :  { %v1493_v53 = vpop.eup %1492  ;;  %1319 = vst [vmem:[#allocation5 + $0x80] sm:$0xff] %v1191_v20  ;;  %v1066_v60 = vadd.f32 1.0, %v1491_v4  ;;  %1504 = vtanh.f32 %v689_v41  ;;  %v690_v14 = vmul.f32 0.7978846, %v562_v1  ;;  %v813_v9 = vmul.f32 0.5, %v1901_v58 }
  0x4a   :  { %1320 = vst [vmem:[#allocation5 + $0x88] sm:$0xff] %v1192_v49  ;;  %v1193_v48 = vmul.f32 %v1065_v5, %v809_v30  ;;  %v1067_v12 = vadd.f32 1.0, %v1493_v53  ;;  %v563_v52 = vadd.f32 %v435_v11, %v1932_v33  ;;  %v308_v24 = vmul.f32 %v180_v15, %v1950_v63 }
  0x4b   :  { %v1194_v21 = vmul.f32 %v1066_v60, %v810_v34  ;;  %1506 = vtanh.f32 %v690_v14  ;;  %v181_v22 = vmul.f32 0.044715, %v1954_v13  ;;  %v814_v28 = vmul.f32 0.5, %v1905_v10 }
  0x4c   :  { %v1495_v59 = vpop.eup %1494  ;;  %1321 = vst [vmem:[#allocation5 + $0x90] sm:$0xff] %v1193_v48  ;;  %v1195_v23 = vmul.f32 %v1067_v12, %v811_v37  ;;  %v691_v25 = vmul.f32 0.7978846, %v563_v52  ;;  %v182_v30 = vmul.f32 0.044715, %v1957_v3  ;;  %v815_v31 = vmul.f32 0.5, %v1908_v44 }
  0x4d   :  { %1322 = vst [vmem:[#allocation5 + $0x98] sm:$0xff] %v1194_v21  ;;  %v1068_v58 = vadd.f32 1.0, %v1495_v59  ;;  %v436_v16 = vmul.f32 %v308_v24, %v1950_v63  ;;  %v309_v2 = vmul.f32 %v181_v22, %v1954_v13  ;;  %v816_v34 = vmul.f32 0.5, %v1912_v17  ;;  %v1998_v12 = vld [vmem:[#allocation2 + $0x120] sm:$0xff]  ;;  %v2004_v59 = vld [vmem:[#allocation2 + $0x130] sm:$0xff] }
  0x4e   :  { %1323 = vst [vmem:[#allocation5 + $0xa0] sm:$0xff] %v1195_v23  ;;  %1508 = vtanh.f32 %v691_v25  ;;  %v310_v10 = vmul.f32 %v182_v30, %v1957_v3  ;;  %v183_v35 = vmul.f32 0.044715, %v1963_v27  ;;  %v184_v44 = vmul.f32 0.044715, %v1967_v62 }
  0x4f   :  { %v1196_v6 = vmul.f32 %v1068_v58, %v812_v46  ;;  %v564_v36 = vadd.f32 %v436_v16, %v1950_v63  ;;  %v437_v37 = vmul.f32 %v309_v2, %v1954_v13  ;;  %v817_v38 = vmul.f32 0.5, %v1916_v19 }
  0x50   :  { %v438_v39 = vmul.f32 %v310_v10, %v1957_v3  ;;  %v311_v40 = vmul.f32 %v183_v35, %v1963_v27  ;;  %v185_v17 = vmul.f32 0.044715, %v1972_v32  ;;  %v818_v8 = vmul.f32 0.5, %v1924_v29 }
  0x51   :  { %v1497_v42 = vpop.eup %1496  ;;  %1324 = vst [vmem:[#allocation5 + $0xa8] sm:$0xff] %v1196_v6  ;;  %v692_v43 = vmul.f32 0.7978846, %v564_v36  ;;  %v565_v45 = vadd.f32 %v437_v37, %v1954_v13  ;;  %v312_v46 = vmul.f32 %v184_v44, %v1967_v62  ;;  %v186_v26 = vmul.f32 0.044715, %v1984_v7  ;;  %v2017_v44 = vld [vmem:[#allocation2 + $0x140] sm:$0xff] }
  0x52   :  { %v1069_v47 = vadd.f32 1.0, %v1497_v42  ;;  %v566_v19 = vadd.f32 %v438_v39, %v1957_v3  ;;  %v439_v18 = vmul.f32 %v311_v40, %v1963_v27  ;;  %v313_v50 = vmul.f32 %v185_v17, %v1972_v32  ;;  %v2023_v17 = vld [vmem:[#allocation2 + $0x148] sm:$0xff] }
  0x53   :  { %v1499_v51 = vpop.eup %1498  ;;  %1510 = vtanh.f32 %v692_v43  ;;  %v693_v54 = vmul.f32 0.7978846, %v565_v45  ;;  %v440_v55 = vmul.f32 %v312_v46, %v1967_v62  ;;  %v819_v24 = vmul.f32 0.5, %v1932_v33  ;;  %v2010_v33 = vld [vmem:[#allocation2 + $0x138] sm:$0xff] }
  0x54   :  { %v1501_v29 = vpop.eup %1500  ;;  %v1197_v56 = vmul.f32 %v1069_v47, %v813_v9  ;;  %v1070_v57 = vadd.f32 1.0, %v1499_v51  ;;  %v694_v61 = vmul.f32 0.7978846, %v566_v19  ;;  %v567_v0 = vadd.f32 %v439_v18, %v1963_v27  ;;  %v2000_v9 = vld [vmem:[#allocation2 + $0x128] sm:$0xff] }
  0x55   :  { %v1503_v20 = vpop.eup %1502  ;;  %v1071_v41 = vadd.f32 1.0, %v1501_v29  ;;  %1512 = vtanh.f32 %v693_v54  ;;  %v568_v1 = vadd.f32 %v440_v55, %v1967_v62  ;;  %v441_v4 = vmul.f32 %v313_v50, %v1972_v32 }
  0x56   :  { %v1505_v49 = vpop.eup %1504  ;;  %1325 = vst [vmem:[#allocation5 + $0xb0] sm:$0xff] %v1197_v56  ;;  %v1198_v5 = vmul.f32 %v1070_v57, %v814_v28  ;;  %v1072_v11 = vadd.f32 1.0, %v1503_v20  ;;  %1514 = vtanh.f32 %v694_v61  ;;  %v695_v53 = vmul.f32 0.7978846, %v567_v0  ;;  %v2039_v20 = vld [vmem:[#allocation2 + $0x150] sm:$0xff] }
  0x57   :  { %v1199_v60 = vmul.f32 %v1071_v41, %v815_v31  ;;  %v1073_v14 = vadd.f32 1.0, %v1505_v49  ;;  %v696_v15 = vmul.f32 0.7978846, %v568_v1  ;;  %v569_v48 = vadd.f32 %v441_v4, %v1972_v32 }
  0x58   :  { %v1507_v52 = vpop.eup %1506  ;;  %1326 = vst [vmem:[#allocation5 + $0xb8] sm:$0xff] %v1198_v5  ;;  %v1200_v21 = vmul.f32 %v1072_v11, %v816_v34  ;;  %1516 = vtanh.f32 %v695_v53  ;;  %v314_v22 = vmul.f32 %v186_v26, %v1984_v7  ;;  %v820_v30 = vmul.f32 0.5, %v1950_v63 }
  0x59   :  { %1327 = vst [vmem:[#allocation5 + $0xc0] sm:$0xff] %v1199_v60  ;;  %v1201_v23 = vmul.f32 %v1073_v14, %v817_v38  ;;  %v1074_v28 = vadd.f32 1.0, %v1507_v52  ;;  %1518 = vtanh.f32 %v696_v15  ;;  %v697_v25 = vmul.f32 0.7978846, %v569_v48  ;;  %v2045_v52 = vld [vmem:[#allocation2 + $0x158] sm:$0xff] }
  0x5a   :  { %1328 = vst [vmem:[#allocation5 + $0xc8] sm:$0xff] %v1200_v21  ;;  %v442_v58 = vmul.f32 %v314_v22, %v1984_v7  ;;  %v187_v31 = vmul.f32 0.044715, %v1998_v12  ;;  %v188_v16 = vmul.f32 0.044715, %v2000_v9  ;;  %v821_v10 = vmul.f32 0.5, %v1954_v13 }
  0x5b   :  { %v1509_v2 = vpop.eup %1508  ;;  %1329 = vst [vmem:[#allocation5 + $0xd0] sm:$0xff] %v1201_v23  ;;  %v1202_v34 = vmul.f32 %v1074_v28, %v818_v8  ;;  %1520 = vtanh.f32 %v697_v25  ;;  %v189_v35 = vmul.f32 0.044715, %v2004_v59  ;;  %v822_v38 = vmul.f32 0.5, %v1957_v3 }
  0x5c   :  { %v1075_v6 = vadd.f32 1.0, %v1509_v2  ;;  %v570_v36 = vadd.f32 %v442_v58, %v1984_v7  ;;  %v315_v63 = vmul.f32 %v187_v31, %v1998_v12  ;;  %v316_v37 = vmul.f32 %v188_v16, %v2000_v9  ;;  %v2050_v58 = vld [vmem:[#allocation2 + $0x160] sm:$0xff] }
  0x5d   :  { %1330 = vst [vmem:[#allocation5 + $0xd8] sm:$0xff] %v1202_v34  ;;  %v823_v39 = vmul.f32 0.5, %v1963_v27  ;;  %v317_v40 = vmul.f32 %v189_v35, %v2004_v59  ;;  %v190_v13 = vmul.f32 0.044715, %v2010_v33  ;;  %v824_v46 = vmul.f32 0.5, %v1967_v62 }
  0x5e   :  { %v1203_v42 = vmul.f32 %v1075_v6, %v819_v24  ;;  %v698_v8 = vmul.f32 0.7978846, %v570_v36  ;;  %v443_v43 = vmul.f32 %v315_v63, %v1998_v12  ;;  %v444_v45 = vmul.f32 %v316_v37, %v2000_v9  ;;  %v2055_v37 = vld [vmem:[#allocation2 + $0x168] sm:$0xff] }
  0x5f   :  { %v445_v47 = vmul.f32 %v317_v40, %v2004_v59  ;;  %v318_v3 = vmul.f32 %v190_v13, %v2010_v33  ;;  %v191_v27 = vmul.f32 0.044715, %v2017_v44  ;;  %v192_v51 = vmul.f32 0.044715, %v2023_v17  ;;  %v2060_v13 = vld [vmem:[#allocation2 + $0x170] sm:$0xff] }
  0x60   :  { %v1511_v19 = vpop.eup %1510  ;;  %1331 = vst [vmem:[#allocation5 + $0xe0] sm:$0xff] %v1203_v42  ;;  %1522 = vtanh.f32 %v698_v8  ;;  %v571_v18 = vadd.f32 %v443_v43, %v1998_v12  ;;  %v572_v50 = vadd.f32 %v444_v45, %v2000_v9  ;;  %v825_v56 = vmul.f32 0.5, %v1972_v32 }
  0x61   :  { %v1076_v54 = vadd.f32 1.0, %v1511_v19  ;;  %v573_v55 = vadd.f32 %v445_v47, %v2004_v59  ;;  %v446_v62 = vmul.f32 %v318_v3, %v2010_v33  ;;  %v319_v26 = vmul.f32 %v191_v27, %v2017_v44  ;;  %v2068_v47 = vld [vmem:[#allocation2 + $0x178] sm:$0xff]  ;;  %v2070_v3 = vld [vmem:[#allocation2 + $0x180] sm:$0xff] }
  0x62   :  { %v1513_v29 = vpop.eup %1512  ;;  %v699_v57 = vmul.f32 0.7978846, %v571_v18  ;;  %v700_v61 = vmul.f32 0.7978846, %v572_v50  ;;  %v320_v0 = vmul.f32 %v192_v51, %v2023_v17  ;;  %v193_v48 = vmul.f32 0.044715, %v2039_v20 }
  0x63   :  { %v1515_v41 = vpop.eup %1514  ;;  %v1204_v1 = vmul.f32 %v1076_v54, %v820_v30  ;;  %v1077_v4 = vadd.f32 1.0, %v1513_v29  ;;  %v701_v49 = vmul.f32 0.7978846, %v573_v55  ;;  %v574_v5 = vadd.f32 %v446_v62, %v2010_v33 }
  0x64   :  { %v1078_v11 = vadd.f32 1.0, %v1515_v41  ;;  %1524 = vtanh.f32 %v699_v57  ;;  %v447_v53 = vmul.f32 %v319_v26, %v2017_v44  ;;  %v448_v60 = vmul.f32 %v320_v0, %v2023_v17 }
  0x65   :  { %v1517_v14 = vpop.eup %1516  ;;  %1332 = vst [vmem:[#allocation5 + $0xe8] sm:$0xff] %v1204_v1  ;;  %v1205_v32 = vmul.f32 %v1077_v4, %v821_v10  ;;  %1526 = vtanh.f32 %v700_v61  ;;  %v702_v15 = vmul.f32 0.7978846, %v574_v5  ;;  %v321_v30 = vmul.f32 %v193_v48, %v2039_v20  ;;  %v2093_v48 = vld [vmem:[#allocation2 + $0x188] sm:$0xff] }
  0x66   :  { %v1519_v21 = vpop.eup %1518  ;;  %v1206_v24 = vmul.f32 %v1078_v11, %v822_v38  ;;  %v1079_v22 = vadd.f32 1.0, %v1517_v14  ;;  %1528 = vtanh.f32 %v701_v49  ;;  %v575_v23 = vadd.f32 %v447_v53, %v2017_v44 }
  0x67   :  { %1333 = vst [vmem:[#allocation5 + $0xf0] sm:$0xff] %v1205_v32  ;;  %v1080_v28 = vadd.f32 1.0, %v1519_v21  ;;  %1530 = vtanh.f32 %v702_v15  ;;  %v576_v25 = vadd.f32 %v448_v60, %v2023_v17  ;;  %v826_v2 = vmul.f32 0.5, %v1984_v7 }
  0x68   :  { %v1521_v31 = vpop.eup %1520  ;;  %1334 = vst [vmem:[#allocation5 + $0xf8] sm:$0xff] %v1206_v24  ;;  %v1207_v16 = vmul.f32 %v1079_v22, %v823_v39  ;;  %v703_v34 = vmul.f32 0.7978846, %v575_v23  ;;  %v194_v10 = vmul.f32 0.044715, %v2045_v52  ;;  %v449_v63 = vmul.f32 %v321_v30, %v2039_v20 }
  0x69   :  { %v1208_v35 = vmul.f32 %v1080_v28, %v824_v46  ;;  %v1081_v6 = vadd.f32 1.0, %v1521_v31  ;;  %v704_v36 = vmul.f32 0.7978846, %v576_v25  ;;  %v827_v38 = vmul.f32 0.5, %v1998_v12 }
  0x6a   :  { %1335 = vst [vmem:[#allocation5 + $0x100] sm:$0xff] %v1207_v16  ;;  %1532 = vtanh.f32 %v703_v34  ;;  %v322_v40 = vmul.f32 %v194_v10, %v2045_v52  ;;  %v195_v39 = vmul.f32 0.044715, %v2050_v58  ;;  %v828_v42 = vmul.f32 0.5, %v2000_v9  ;;  %v2096_v16 = vld [vmem:[#allocation2 + $0x190] sm:$0xff] }
  0x6b   :  { %1336 = vst [vmem:[#allocation5 + $0x108] sm:$0xff] %v1208_v35  ;;  %v1209_v7 = vmul.f32 %v1081_v6, %v825_v56  ;;  %1534 = vtanh.f32 %v704_v36  ;;  %v577_v8 = vadd.f32 %v449_v63, %v2039_v20  ;;  %v829_v43 = vmul.f32 0.5, %v2004_v59  ;;  %v2100_v35 = vld [vmem:[#allocation2 + $0x198] sm:$0xff] }
  0x6c   :  { %v450_v45 = vmul.f32 %v322_v40, %v2045_v52  ;;  %v323_v12 = vmul.f32 %v195_v39, %v2050_v58  ;;  %v196_v46 = vmul.f32 0.044715, %v2055_v37  ;;  %v830_v19 = vmul.f32 0.5, %v2010_v33 }
  0x6d   :  { %v1523_v27 = vpop.eup %1522  ;;  %1337 = vst [vmem:[#allocation5 + $0x110] sm:$0xff] %v1209_v7  ;;  %v2074_v9 = vmul.f32 0.5, %v2017_v44  ;;  %v705_v18 = vmul.f32 0.7978846, %v577_v8  ;;  %v197_v59 = vmul.f32 0.044715, %v2060_v13 }
  0x6e   :  { %v1082_v50 = vadd.f32 1.0, %v1523_v27  ;;  %v578_v51 = vadd.f32 %v450_v45, %v2045_v52  ;;  %v451_v54 = vmul.f32 %v323_v12, %v2050_v58  ;;  %v324_v55 = vmul.f32 %v196_v46, %v2055_v37 }
  0x6f   :  { %1536 = vtanh.f32 %v705_v18  ;;  %v325_v62 = vmul.f32 %v197_v59, %v2060_v13  ;;  %v198_v26 = vmul.f32 0.044715, %v2068_v47  ;;  %v199_v33 = vmul.f32 0.044715, %v2070_v3 }
  0x70   :  { %v1210_v29 = vmul.f32 %v1082_v50, %v826_v2  ;;  %v706_v44 = vmul.f32 0.7978846, %v578_v51  ;;  %v579_v56 = vadd.f32 %v451_v54, %v2050_v58  ;;  %v452_v57 = vmul.f32 %v324_v55, %v2055_v37 }
  0x71   :  { %v1525_v61 = vpop.eup %1524  ;;  %v832_v0 = vmul.f32 0.5, %v2023_v17  ;;  %v453_v41 = vmul.f32 %v325_v62, %v2060_v13  ;;  %v326_v1 = vmul.f32 %v198_v26, %v2068_v47  ;;  %v327_v4 = vmul.f32 %v199_v33, %v2070_v3 }
  0x72   :  { %v1527_v49 = vpop.eup %1526  ;;  %1338 = vst [vmem:[#allocation5 + $0x118] sm:$0xff] %v1210_v29  ;;  %v1083_v5 = vadd.f32 1.0, %v1525_v61  ;;  %1538 = vtanh.f32 %v706_v44  ;;  %v707_v11 = vmul.f32 0.7978846, %v579_v56  ;;  %v580_v53 = vadd.f32 %v452_v57, %v2055_v37 }
  0x73   :  { %v1529_v60 = vpop.eup %1528  ;;  %v1084_v14 = vadd.f32 1.0, %v1527_v49  ;;  %v581_v32 = vadd.f32 %v453_v41, %v2060_v13  ;;  %v454_v15 = vmul.f32 %v326_v1, %v2068_v47  ;;  %v455_v17 = vmul.f32 %v327_v4, %v2070_v3  ;;  %v2129_v41 = vld [vmem:[#allocation2 + $0x1b8] sm:$0xff] }
  0x74   :  { %v1531_v21 = vpop.eup %1530  ;;  %v1211_v24 = vmul.f32 %v1083_v5, %v827_v38  ;;  %v1085_v22 = vadd.f32 1.0, %v1529_v60  ;;  %1540 = vtanh.f32 %v707_v11  ;;  %v708_v23 = vmul.f32 0.7978846, %v580_v53 }
  0x75   :  { %v1212_v28 = vmul.f32 %v1084_v14, %v828_v42  ;;  %v1086_v25 = vadd.f32 1.0, %v1531_v21  ;;  %v709_v30 = vmul.f32 0.7978846, %v581_v32  ;;  %v582_v31 = vadd.f32 %v454_v15, %v2068_v47 }
  0x76   :  { %1339 = vst [vmem:[#allocation5 + $0x120] sm:$0xff] %v1211_v24  ;;  %v1213_v2 = vmul.f32 %v1085_v22, %v829_v43  ;;  %1542 = vtanh.f32 %v708_v23  ;;  %v583_v34 = vadd.f32 %v455_v17, %v2070_v3  ;;  %v200_v10 = vmul.f32 0.044715, %v2093_v48  ;;  %v2105_v43 = vld [vmem:[#allocation2 + $0x1a0] sm:$0xff] }
  0x77   :  { %v1533_v6 = vpop.eup %1532  ;;  %1340 = vst [vmem:[#allocation5 + $0x128] sm:$0xff] %v1212_v28  ;;  %v1214_v36 = vmul.f32 %v1086_v25, %v830_v19  ;;  %v833_v63 = vmul.f32 0.5, %v2039_v20  ;;  %1544 = vtanh.f32 %v709_v30  ;;  %v710_v38 = vmul.f32 0.7978846, %v582_v31  ;;  %v2109_v20 = vld [vmem:[#allocation2 + $0x1a8] sm:$0xff]  ;;  %v2141_v31 = vld [vmem:[#allocation2 + $0x1c0] sm:$0xff] }
  0x78   :  { %v1535_v40 = vpop.eup %1534  ;;  %1341 = vst [vmem:[#allocation5 + $0x130] sm:$0xff] %v1213_v2  ;;  %v1087_v39 = vadd.f32 1.0, %v1533_v6  ;;  %v711_v7 = vmul.f32 0.7978846, %v583_v34  ;;  %v328_v42 = vmul.f32 %v200_v10, %v2093_v48  ;;  %v201_v8 = vmul.f32 0.044715, %v2096_v16 }
  0x79   :  { %1342 = vst [vmem:[#allocation5 + $0x138] sm:$0xff] %v1214_v36  ;;  %v1088_v45 = vadd.f32 1.0, %v1535_v40  ;;  %v834_v12 = vmul.f32 0.5, %v2045_v52  ;;  %1546 = vtanh.f32 %v710_v38  ;;  %v202_v46 = vmul.f32 0.044715, %v2100_v35  ;;  %v2117_v52 = vld [vmem:[#allocation2 + $0x1b0] sm:$0xff] }
  0x7a   :  { %v1215_v27 = vmul.f32 %v1087_v39, %v2074_v9  ;;  %1548 = vtanh.f32 %v711_v7  ;;  %v456_v19 = vmul.f32 %v328_v42, %v2093_v48  ;;  %v329_v18 = vmul.f32 %v201_v8, %v2096_v16  ;;  %v2146_v39 = vld [vmem:[#allocation2 + $0x1c8] sm:$0xff] }
  0x7b   :  { %v1216_v59 = vmul.f32 %v1088_v45, %v832_v0  ;;  %v835_v50 = vmul.f32 0.5, %v2050_v58  ;;  %v330_v51 = vmul.f32 %v202_v46, %v2100_v35  ;;  %v203_v54 = vmul.f32 0.044715, %v2105_v43 }
  0x7c   :  { %v1537_v55 = vpop.eup %1536  ;;  %1343 = vst [vmem:[#allocation5 + $0x140] sm:$0xff] %v1215_v27  ;;  %v836_v62 = vmul.f32 0.5, %v2055_v37  ;;  %v584_v9 = vadd.f32 %v456_v19, %v2093_v48  ;;  %v457_v26 = vmul.f32 %v329_v18, %v2096_v16  ;;  %v204_v33 = vmul.f32 0.044715, %v2109_v20 }
  0x7d   :  { %1344 = vst [vmem:[#allocation5 + $0x148] sm:$0xff] %v1216_v59  ;;  %v1089_v29 = vadd.f32 1.0, %v1537_v55  ;;  %v837_v58 = vmul.f32 0.5, %v2060_v13  ;;  %v458_v44 = vmul.f32 %v330_v51, %v2100_v35  ;;  %v331_v56 = vmul.f32 %v203_v54, %v2105_v43 }
  0x7e   :  { %v712_v57 = vmul.f32 0.7978846, %v584_v9  ;;  %v585_v61 = vadd.f32 %v457_v26, %v2096_v16  ;;  %v332_v0 = vmul.f32 %v204_v33, %v2109_v20  ;;  %v205_v37 = vmul.f32 0.044715, %v2117_v52  ;;  %v2159_v26 = vld [vmem:[#allocation2 + $0x1e0] sm:$0xff] }
  0x7f   :  { %v1539_v1 = vpop.eup %1538  ;;  %v1217_v4 = vmul.f32 %v1089_v29, %v833_v63  ;;  %v838_v49 = vmul.f32 0.5, %v2068_v47  ;;  %v586_v5 = vadd.f32 %v458_v44, %v2100_v35  ;;  %v459_v13 = vmul.f32 %v331_v56, %v2105_v43  ;;  %v2164_v44 = vld [vmem:[#allocation2 + $0x1e8] sm:$0xff] }
  0x80   :  { %v1090_v11 = vadd.f32 1.0, %v1539_v1  ;;  %1550 = vtanh.f32 %v712_v57  ;;  %v713_v53 = vmul.f32 0.7978846, %v585_v61  ;;  %v460_v60 = vmul.f32 %v332_v0, %v2109_v20 }
  0x81   :  { %v1541_v14 = vpop.eup %1540  ;;  %1345 = vst [vmem:[#allocation5 + $0x150] sm:$0xff] %v1217_v4  ;;  %v714_v32 = vmul.f32 0.7978846, %v586_v5  ;;  %v587_v15 = vadd.f32 %v459_v13, %v2105_v43  ;;  %v333_v17 = vmul.f32 %v205_v37, %v2117_v52  ;;  %v206_v21 = vmul.f32 0.044715, %v2129_v41  ;;  %v2173_v4 = vld [vmem:[#allocation2 + $0x1f0] sm:$0xff] }
  0x82   :  { %v1218_v24 = vmul.f32 %v1090_v11, %v834_v12  ;;  %v1091_v47 = vadd.f32 1.0, %v1541_v14  ;;  %1552 = vtanh.f32 %v713_v53  ;;  %v588_v22 = vadd.f32 %v460_v60, %v2109_v20  ;;  %v2150_v12 = vld [vmem:[#allocation2 + $0x1d0] sm:$0xff] }
  0x83   :  { %v1543_v23 = vpop.eup %1542  ;;  %1554 = vtanh.f32 %v714_v32  ;;  %v715_v28 = vmul.f32 0.7978846, %v587_v15  ;;  %v461_v25 = vmul.f32 %v333_v17, %v2117_v52  ;;  %v334_v30 = vmul.f32 %v206_v21, %v2129_v41 }
  0x84   :  { %v1545_v2 = vpop.eup %1544  ;;  %1346 = vst [vmem:[#allocation5 + $0x158] sm:$0xff] %v1218_v24  ;;  %v1219_v34 = vmul.f32 %v1091_v47, %v835_v50  ;;  %v1092_v10 = vadd.f32 1.0, %v1543_v23  ;;  %v839_v6 = vmul.f32 0.5, %v2070_v3  ;;  %v716_v36 = vmul.f32 0.7978846, %v588_v22 }
  0x85   :  { %v1093_v63 = vadd.f32 1.0, %v1545_v2  ;;  %1556 = vtanh.f32 %v715_v28  ;;  %v589_v38 = vadd.f32 %v461_v25, %v2117_v52  ;;  %v462_v40 = vmul.f32 %v334_v30, %v2129_v41 }
  0x86   :  { %v1547_v7 = vpop.eup %1546  ;;  %1347 = vst [vmem:[#allocation5 + $0x160] sm:$0xff] %v1219_v34  ;;  %v1220_v42 = vmul.f32 %v1092_v10, %v836_v62  ;;  %v840_v8 = vmul.f32 0.5, %v2093_v48  ;;  %1558 = vtanh.f32 %v716_v36  ;;  %v207_v45 = vmul.f32 0.044715, %v2141_v31  ;;  %v2156_v48 = vld [vmem:[#allocation2 + $0x1d8] sm:$0xff] }
  0x87   :  { %v1549_v3 = vpop.eup %1548  ;;  %v1221_v46 = vmul.f32 %v1093_v63, %v837_v58  ;;  %v1094_v27 = vadd.f32 1.0, %v1547_v7  ;;  %v717_v19 = vmul.f32 0.7978846, %v589_v38  ;;  %v590_v18 = vadd.f32 %v462_v40, %v2129_v41  ;;  %v2191_v63 = vld [vmem:[#allocation2 + $0x1f8] sm:$0xff] }
  0x88   :  { %1348 = vst [vmem:[#allocation5 + $0x168] sm:$0xff] %v1220_v42  ;;  %v1095_v59 = vadd.f32 1.0, %v1549_v3  ;;  %v841_v50 = vmul.f32 0.5, %v2096_v16  ;;  %v335_v51 = vmul.f32 %v207_v45, %v2141_v31  ;;  %v208_v54 = vmul.f32 0.044715, %v2146_v39 }
  0x89   :  { %1349 = vst [vmem:[#allocation5 + $0x170] sm:$0xff] %v1221_v46  ;;  %v1222_v55 = vmul.f32 %v1094_v27, %v838_v49  ;;  %1560 = vtanh.f32 %v717_v19  ;;  %v718_v62 = vmul.f32 0.7978846, %v590_v18  ;;  %v209_v9 = vmul.f32 0.044715, %v2150_v12  ;;  %v2196_v27 = vld [vmem:[#allocation2 + $0x200] sm:$0xff] }
  0x8a   :  { %v1223_v33 = vmul.f32 %v1095_v59, %v839_v6  ;;  %v842_v29 = vmul.f32 0.5, %v2100_v35  ;;  %v463_v58 = vmul.f32 %v335_v51, %v2141_v31  ;;  %v336_v16 = vmul.f32 %v208_v54, %v2146_v39 }
  0x8b   :  { %1350 = vst [vmem:[#allocation5 + $0x178] sm:$0xff] %v1222_v55  ;;  %v843_v56 = vmul.f32 0.5, %v2105_v43  ;;  %1562 = vtanh.f32 %v718_v62  ;;  %v337_v57 = vmul.f32 %v209_v9, %v2150_v12  ;;  %v210_v61 = vmul.f32 0.044715, %v2156_v48 }
  0x8c   :  { %1351 = vst [vmem:[#allocation5 + $0x180] sm:$0xff] %v1223_v33  ;;  %v844_v0 = vmul.f32 0.5, %v2109_v20  ;;  %v591_v37 = vadd.f32 %v463_v58, %v2141_v31  ;;  %v464_v35 = vmul.f32 %v336_v16, %v2146_v39  ;;  %v211_v1 = vmul.f32 0.044715, %v2159_v26 }
  0x8d   :  { %v1551_v49 = vpop.eup %1550  ;;  %v2176_v5 = vmul.f32 0.5, %v2117_v52  ;;  %v465_v43 = vmul.f32 %v337_v57, %v2150_v12  ;;  %v338_v13 = vmul.f32 %v210_v61, %v2156_v48  ;;  %v212_v11 = vmul.f32 0.044715, %v2164_v44 }
  0x8e   :  { %v1096_v53 = vadd.f32 1.0, %v1551_v49  ;;  %v719_v20 = vmul.f32 0.7978846, %v591_v37  ;;  %v592_v60 = vadd.f32 %v464_v35, %v2146_v39  ;;  %v339_v14 = vmul.f32 %v211_v1, %v2159_v26  ;;  %v2212_v1 = vld [vmem:[#allocation2 + $0x218] sm:$0xff] }
  0x8f   :  { %v1553_v32 = vpop.eup %1552  ;;  %v593_v15 = vadd.f32 %v465_v43, %v2150_v12  ;;  %v466_v17 = vmul.f32 %v338_v13, %v2156_v48  ;;  %v340_v52 = vmul.f32 %v212_v11, %v2164_v44  ;;  %v213_v21 = vmul.f32 0.044715, %v2173_v4  ;;  %v2217_v13 = vld [vmem:[#allocation2 + $0x220] sm:$0xff] }
  0x90   :  { %v1555_v24 = vpop.eup %1554  ;;  %v1224_v47 = vmul.f32 %v1096_v53, %v840_v8  ;;  %v1097_v22 = vadd.f32 1.0, %v1553_v32  ;;  %1564 = vtanh.f32 %v719_v20  ;;  %v720_v23 = vmul.f32 0.7978846, %v592_v60 }
  0x91   :  { %v1098_v28 = vadd.f32 1.0, %v1555_v24  ;;  %v721_v25 = vmul.f32 0.7978846, %v593_v15  ;;  %v594_v30 = vadd.f32 %v466_v17, %v2156_v48  ;;  %v467_v2 = vmul.f32 %v339_v14, %v2159_v26  ;;  %v2228_v15 = vld [vmem:[#allocation2 + $0x228] sm:$0xff] }
  0x92   :  { %v1557_v34 = vpop.eup %1556  ;;  %1352 = vst [vmem:[#allocation5 + $0x188] sm:$0xff] %v1224_v47  ;;  %v1225_v10 = vmul.f32 %v1097_v22, %v841_v50  ;;  %1566 = vtanh.f32 %v720_v23  ;;  %v468_v6 = vmul.f32 %v340_v52, %v2164_v44  ;;  %v341_v36 = vmul.f32 %v213_v21, %v2173_v4  ;;  %v2200_v50 = vld [vmem:[#allocation2 + $0x208] sm:$0xff] }
  0x93   :  { %v1559_v38 = vpop.eup %1558  ;;  %v1226_v40 = vmul.f32 %v1098_v28, %v842_v29  ;;  %v1099_v7 = vadd.f32 1.0, %v1557_v34  ;;  %1568 = vtanh.f32 %v721_v25  ;;  %v722_v42 = vmul.f32 0.7978846, %v594_v30 }
  0x94   :  { %1353 = vst [vmem:[#allocation5 + $0x190] sm:$0xff] %v1225_v10  ;;  %v1100_v8 = vadd.f32 1.0, %v1559_v38  ;;  %v595_v45 = vadd.f32 %v467_v2, %v2159_v26  ;;  %v596_v3 = vadd.f32 %v468_v6, %v2164_v44  ;;  %v469_v46 = vmul.f32 %v341_v36, %v2173_v4 }
  0x95   :  { %1354 = vst [vmem:[#allocation5 + $0x198] sm:$0xff] %v1226_v40  ;;  %v1227_v19 = vmul.f32 %v1099_v7, %v843_v56  ;;  %v846_v18 = vmul.f32 0.5, %v2129_v41  ;;  %1570 = vtanh.f32 %v722_v42  ;;  %v214_v59 = vmul.f32 0.044715, %v2191_v63 }
  0x96   :  { %v1561_v51 = vpop.eup %1560  ;;  %v1228_v54 = vmul.f32 %v1100_v8, %v844_v0  ;;  %v723_v55 = vmul.f32 0.7978846, %v595_v45  ;;  %v724_v62 = vmul.f32 0.7978846, %v596_v3  ;;  %v597_v9 = vadd.f32 %v469_v46, %v2173_v4  ;;  %v2208_v0 = vld [vmem:[#allocation2 + $0x210] sm:$0xff] }
  0x97   :  { %1355 = vst [vmem:[#allocation5 + $0x1a0] sm:$0xff] %v1227_v19  ;;  %v1101_v33 = vadd.f32 1.0, %v1561_v51  ;;  %v847_v29 = vmul.f32 0.5, %v2141_v31  ;;  %v342_v58 = vmul.f32 %v214_v59, %v2191_v63  ;;  %v215_v16 = vmul.f32 0.044715, %v2196_v27  ;;  %v2242_v8 = vld [vmem:[#allocation2 + $0x230] sm:$0xff] }
  0x98   :  { %v1563_v41 = vpop.eup %1562  ;;  %1356 = vst [vmem:[#allocation5 + $0x1a8] sm:$0xff] %v1228_v54  ;;  %v848_v56 = vmul.f32 0.5, %v2146_v39  ;;  %1572 = vtanh.f32 %v723_v55  ;;  %v725_v57 = vmul.f32 0.7978846, %v597_v9  ;;  %v216_v61 = vmul.f32 0.044715, %v2200_v50 }
  0x99   :  { %v1229_v37 = vmul.f32 %v1101_v33, %v2176_v5  ;;  %v1102_v35 = vadd.f32 1.0, %v1563_v41  ;;  %1574 = vtanh.f32 %v724_v62  ;;  %v470_v31 = vmul.f32 %v342_v58, %v2191_v63 }
  0x9a   :  { %v849_v49 = vmul.f32 0.5, %v2150_v12  ;;  %1576 = vtanh.f32 %v725_v57  ;;  %v343_v43 = vmul.f32 %v215_v16, %v2196_v27  ;;  %v344_v39 = vmul.f32 %v216_v61, %v2200_v50 }
  0x9b   :  { %1357 = vst [vmem:[#allocation5 + $0x1b0] sm:$0xff] %v1229_v37  ;;  %v1230_v11 = vmul.f32 %v1102_v35, %v846_v18  ;;  %v850_v53 = vmul.f32 0.5, %v2156_v48  ;;  %v598_v5 = vadd.f32 %v470_v31, %v2191_v63  ;;  %v217_v20 = vmul.f32 0.044715, %v2208_v0  ;;  %v2246_v18 = vld [vmem:[#allocation2 + $0x238] sm:$0xff] }
  0x9c   :  { %v2223_v60 = vmul.f32 0.5, %v2159_v26  ;;  %v471_v12 = vmul.f32 %v343_v43, %v2196_v27  ;;  %v472_v14 = vmul.f32 %v344_v39, %v2200_v50  ;;  %v218_v32 = vmul.f32 0.044715, %v2212_v1 }
  0x9d   :  { %v1565_v17 = vpop.eup %1564  ;;  %1358 = vst [vmem:[#allocation5 + $0x1b8] sm:$0xff] %v1230_v11  ;;  %v852_v52 = vmul.f32 0.5, %v2164_v44  ;;  %v726_v48 = vmul.f32 0.7978846, %v598_v5  ;;  %v345_v21 = vmul.f32 %v217_v20, %v2208_v0  ;;  %v219_v24 = vmul.f32 0.044715, %v2217_v13 }
  0x9e   :  { %v1103_v47 = vadd.f32 1.0, %v1565_v17  ;;  %v599_v26 = vadd.f32 %v471_v12, %v2196_v27  ;;  %v600_v22 = vadd.f32 %v472_v14, %v2200_v50  ;;  %v346_v23 = vmul.f32 %v218_v32, %v2212_v1  ;;  %v2258_v11 = vld [vmem:[#allocation2 + $0x240] sm:$0xff]  ;;  %v2261_v20 = vld [vmem:[#allocation2 + $0x248] sm:$0xff]  ;;  %v2267_v17 = vld [vmem:[#allocation2 + $0x258] sm:$0xff] }
  0x9f   :  { %v1567_v28 = vpop.eup %1566  ;;  %1578 = vtanh.f32 %v726_v48  ;;  %v473_v25 = vmul.f32 %v345_v21, %v2208_v0  ;;  %v347_v30 = vmul.f32 %v219_v24, %v2217_v13  ;;  %v220_v44 = vmul.f32 0.044715, %v2228_v15 }
  0xa0   :  { %v1569_v2 = vpop.eup %1568  ;;  %v1231_v34 = vmul.f32 %v1103_v47, %v847_v29  ;;  %v1104_v10 = vadd.f32 1.0, %v1567_v28  ;;  %v727_v6 = vmul.f32 0.7978846, %v599_v26  ;;  %v728_v36 = vmul.f32 0.7978846, %v600_v22 }
  0xa1   :  { %v1105_v38 = vadd.f32 1.0, %v1569_v2  ;;  %v601_v40 = vadd.f32 %v473_v25, %v2208_v0  ;;  %v474_v7 = vmul.f32 %v346_v23, %v2212_v1  ;;  %v475_v42 = vmul.f32 %v347_v30, %v2217_v13  ;;  %v2281_v30 = vld [vmem:[#allocation2 + $0x260] sm:$0xff] }
  0xa2   :  { %v1571_v45 = vpop.eup %1570  ;;  %1359 = vst [vmem:[#allocation5 + $0x1c0] sm:$0xff] %v1231_v34  ;;  %v1232_v3 = vmul.f32 %v1104_v10, %v848_v56  ;;  %v853_v46 = vmul.f32 0.5, %v2173_v4  ;;  %1580 = vtanh.f32 %v727_v6  ;;  %v348_v19 = vmul.f32 %v220_v44, %v2228_v15 }
  0xa3   :  { %v1233_v59 = vmul.f32 %v1105_v38, %v849_v49  ;;  %v1106_v51 = vadd.f32 1.0, %v1571_v45  ;;  %1582 = vtanh.f32 %v728_v36  ;;  %v729_v54 = vmul.f32 0.7978846, %v601_v40 }
  0xa4   :  { %1360 = vst [vmem:[#allocation5 + $0x1c8] sm:$0xff] %v1232_v3  ;;  %v602_v55 = vadd.f32 %v474_v7, %v2212_v1  ;;  %v603_v62 = vadd.f32 %v475_v42, %v2217_v13  ;;  %v476_v9 = vmul.f32 %v348_v19, %v2228_v15  ;;  %v221_v33 = vmul.f32 0.044715, %v2242_v8 }
  0xa5   :  { %v1573_v29 = vpop.eup %1572  ;;  %1361 = vst [vmem:[#allocation5 + $0x1d0] sm:$0xff] %v1233_v59  ;;  %v1234_v4 = vmul.f32 %v1106_v51, %v850_v53  ;;  %v854_v58 = vmul.f32 0.5, %v2191_v63  ;;  %1584 = vtanh.f32 %v729_v54  ;;  %v222_v16 = vmul.f32 0.044715, %v2246_v18 }
  0xa6   :  { %v1575_v41 = vpop.eup %1574  ;;  %v1107_v56 = vadd.f32 1.0, %v1573_v29  ;;  %v730_v57 = vmul.f32 0.7978846, %v602_v55  ;;  %v731_v61 = vmul.f32 0.7978846, %v603_v62  ;;  %v604_v37 = vadd.f32 %v476_v9, %v2228_v15  ;;  %v2295_v55 = vld [vmem:[#allocation2 + $0x268] sm:$0xff] }
  0xa7   :  { %v1577_v35 = vpop.eup %1576  ;;  %1362 = vst [vmem:[#allocation5 + $0x1d8] sm:$0xff] %v1234_v4  ;;  %v1108_v31 = vadd.f32 1.0, %v1575_v41  ;;  %v855_v49 = vmul.f32 0.5, %v2196_v27  ;;  %v349_v43 = vmul.f32 %v221_v33, %v2242_v8  ;;  %v350_v39 = vmul.f32 %v222_v16, %v2246_v18  ;;  %v2265_v27 = vld [vmem:[#allocation2 + $0x250] sm:$0xff] }
  0xa8   :  { %v1235_v63 = vmul.f32 %v1107_v56, %v2223_v60  ;;  %v1109_v53 = vadd.f32 1.0, %v1577_v35  ;;  %1586 = vtanh.f32 %v730_v57  ;;  %v732_v5 = vmul.f32 0.7978846, %v604_v37  ;;  %v2302_v35 = vld [vmem:[#allocation2 + $0x270] sm:$0xff] }
  0xa9   :  { %v1236_v12 = vmul.f32 %v1108_v31, %v852_v52  ;;  %1588 = vtanh.f32 %v731_v61  ;;  %v477_v14 = vmul.f32 %v349_v43, %v2242_v8  ;;  %v478_v32 = vmul.f32 %v350_v39, %v2246_v18 }
  0xaa   :  { %1363 = vst [vmem:[#allocation5 + $0x1e0] sm:$0xff] %v1235_v63  ;;  %v1237_v48 = vmul.f32 %v1109_v53, %v853_v46  ;;  %v856_v21 = vmul.f32 0.5, %v2200_v50  ;;  %1590 = vtanh.f32 %v732_v5  ;;  %v223_v60 = vmul.f32 0.044715, %v2258_v11 }
  0xab   :  { %1364 = vst [vmem:[#allocation5 + $0x1e8] sm:$0xff] %v1236_v12  ;;  %v857_v24 = vmul.f32 0.5, %v2208_v0  ;;  %v605_v52 = vadd.f32 %v477_v14, %v2242_v8  ;;  %v606_v47 = vadd.f32 %v478_v32, %v2246_v18  ;;  %v224_v26 = vmul.f32 0.044715, %v2261_v20  ;;  %v2307_v12 = vld [vmem:[#allocation2 + $0x278] sm:$0xff] }
  0xac   :  { %v1579_v22 = vpop.eup %1578  ;;  %1365 = vst [vmem:[#allocation5 + $0x1f0] sm:$0xff] %v1237_v48  ;;  %v2276_v23 = vmul.f32 0.5, %v2212_v1  ;;  %v351_v28 = vmul.f32 %v223_v60, %v2258_v11  ;;  %v225_v50 = vmul.f32 0.044715, %v2265_v27  ;;  %v226_v25 = vmul.f32 0.044715, %v2267_v17 }
  0xad   :  { %v1110_v0 = vadd.f32 1.0, %v1579_v22  ;;  %v733_v44 = vmul.f32 0.7978846, %v605_v52  ;;  %v734_v2 = vmul.f32 0.7978846, %v606_v47  ;;  %v352_v34 = vmul.f32 %v224_v26, %v2261_v20  ;;  %v2315_v26 = vld [vmem:[#allocation2 + $0x288] sm:$0xff] }
  0xae   :  { %v859_v10 = vmul.f32 0.5, %v2217_v13  ;;  %v479_v6 = vmul.f32 %v351_v28, %v2258_v11  ;;  %v353_v1 = vmul.f32 %v225_v50, %v2265_v27  ;;  %v354_v36 = vmul.f32 %v226_v25, %v2267_v17  ;;  %v2320_v25 = vld [vmem:[#allocation2 + $0x290] sm:$0xff] }
  0xaf   :  { %v1581_v38 = vpop.eup %1580  ;;  %v1238_v40 = vmul.f32 %v1110_v0, %v854_v58  ;;  %1592 = vtanh.f32 %v733_v44  ;;  %v480_v7 = vmul.f32 %v352_v34, %v2261_v20  ;;  %v227_v42 = vmul.f32 0.044715, %v2281_v30 }
  0xb0   :  { %v1583_v45 = vpop.eup %1582  ;;  %v1111_v3 = vadd.f32 1.0, %v1581_v38  ;;  %1594 = vtanh.f32 %v734_v2  ;;  %v607_v46 = vadd.f32 %v479_v6, %v2258_v11  ;;  %v481_v13 = vmul.f32 %v353_v1, %v2265_v27 }
  0xb1   :  { %1366 = vst [vmem:[#allocation5 + $0x1f8] sm:$0xff] %v1238_v40  ;;  %v1112_v19 = vadd.f32 1.0, %v1583_v45  ;;  %v608_v59 = vadd.f32 %v480_v7, %v2261_v20  ;;  %v482_v51 = vmul.f32 %v354_v36, %v2267_v17  ;;  %v355_v54 = vmul.f32 %v227_v42, %v2281_v30 }
  0xb2   :  { %v1585_v62 = vpop.eup %1584  ;;  %v1239_v9 = vmul.f32 %v1111_v3, %v855_v49  ;;  %v860_v33 = vmul.f32 0.5, %v2228_v15  ;;  %v735_v29 = vmul.f32 0.7978846, %v607_v46  ;;  %v609_v4 = vadd.f32 %v481_v13, %v2265_v27 }
  0xb3   :  { %v1240_v58 = vmul.f32 %v1112_v19, %v856_v21  ;;  %v1113_v16 = vadd.f32 1.0, %v1585_v62  ;;  %v736_v41 = vmul.f32 0.7978846, %v608_v59  ;;  %v610_v56 = vadd.f32 %v482_v51, %v2267_v17 }
  0xb4   :  { %1367 = vst [vmem:[#allocation5 + $0x200] sm:$0xff] %v1239_v9  ;;  %1596 = vtanh.f32 %v735_v29  ;;  %v737_v57 = vmul.f32 0.7978846, %v609_v4  ;;  %v483_v61 = vmul.f32 %v355_v54, %v2281_v30  ;;  %v228_v37 = vmul.f32 0.044715, %v2295_v55 }
  0xb5   :  { %v1587_v31 = vpop.eup %1586  ;;  %1368 = vst [vmem:[#allocation5 + $0x208] sm:$0xff] %v1240_v58  ;;  %v1241_v15 = vmul.f32 %v1113_v16, %v857_v24  ;;  %v861_v49 = vmul.f32 0.5, %v2242_v8  ;;  %1598 = vtanh.f32 %v736_v41  ;;  %v738_v43 = vmul.f32 0.7978846, %v610_v56  ;;  %v2311_v8 = vld [vmem:[#allocation2 + $0x280] sm:$0xff] }
  0xb6   :  { %v1589_v39 = vpop.eup %1588  ;;  %v1114_v63 = vadd.f32 1.0, %v1587_v31  ;;  %1600 = vtanh.f32 %v737_v57  ;;  %v611_v53 = vadd.f32 %v483_v61, %v2281_v30  ;;  %v356_v5 = vmul.f32 %v228_v37, %v2295_v55 }
  0xb7   :  { %v1591_v14 = vpop.eup %1590  ;;  %1369 = vst [vmem:[#allocation5 + $0x210] sm:$0xff] %v1241_v15  ;;  %v1115_v32 = vadd.f32 1.0, %v1589_v39  ;;  %v862_v48 = vmul.f32 0.5, %v2246_v18  ;;  %1602 = vtanh.f32 %v738_v43  ;;  %v229_v21 = vmul.f32 0.044715, %v2302_v35 }
  0xb8   :  { %v1242_v60 = vmul.f32 %v1114_v63, %v2276_v23  ;;  %v1116_v24 = vadd.f32 1.0, %v1591_v14  ;;  %v739_v52 = vmul.f32 0.7978846, %v611_v53  ;;  %v484_v47 = vmul.f32 %v356_v5, %v2295_v55  ;;  %v2348_v63 = vld [vmem:[#allocation2 + $0x2a0] sm:$0xff] }
  0xb9   :  { %v1243_v22 = vmul.f32 %v1115_v32, %v859_v10  ;;  %v863_v28 = vmul.f32 0.5, %v2258_v11  ;;  %v357_v50 = vmul.f32 %v229_v21, %v2302_v35  ;;  %v230_v18 = vmul.f32 0.044715, %v2307_v12 }
  0xba   :  { %1370 = vst [vmem:[#allocation5 + $0x218] sm:$0xff] %v1242_v60  ;;  %v1244_v0 = vmul.f32 %v1116_v24, %v860_v33  ;;  %1604 = vtanh.f32 %v739_v52  ;;  %v612_v23 = vadd.f32 %v484_v47, %v2295_v55  ;;  %v231_v44 = vmul.f32 0.044715, %v2311_v8  ;;  %v2353_v24 = vld [vmem:[#allocation2 + $0x2b0] sm:$0xff] }
  0xbb   :  { %1371 = vst [vmem:[#allocation5 + $0x220] sm:$0xff] %v1243_v22  ;;  %v864_v2 = vmul.f32 0.5, %v2261_v20  ;;  %v485_v34 = vmul.f32 %v357_v50, %v2302_v35  ;;  %v358_v11 = vmul.f32 %v230_v18, %v2307_v12  ;;  %v232_v10 = vmul.f32 0.044715, %v2315_v26 }
  0xbc   :  { %v1593_v6 = vpop.eup %1592  ;;  %1372 = vst [vmem:[#allocation5 + $0x228] sm:$0xff] %v1244_v0  ;;  %v865_v1 = vmul.f32 0.5, %v2265_v27  ;;  %v740_v36 = vmul.f32 0.7978846, %v612_v23  ;;  %v359_v38 = vmul.f32 %v231_v44, %v2311_v8  ;;  %v233_v40 = vmul.f32 0.044715, %v2320_v25 }
  0xbd   :  { %v1595_v7 = vpop.eup %1594  ;;  %v1117_v42 = vadd.f32 1.0, %v1593_v6  ;;  %v613_v45 = vadd.f32 %v485_v34, %v2302_v35  ;;  %v486_v20 = vmul.f32 %v358_v11, %v2307_v12  ;;  %v360_v3 = vmul.f32 %v232_v10, %v2315_v26  ;;  %v2336_v27 = vld [vmem:[#allocation2 + $0x298] sm:$0xff] }
  0xbe   :  { %v1118_v46 = vadd.f32 1.0, %v1595_v7  ;;  %1606 = vtanh.f32 %v740_v36  ;;  %v487_v13 = vmul.f32 %v359_v38, %v2311_v8  ;;  %v361_v19 = vmul.f32 %v233_v40, %v2320_v25 }
  0xbf   :  { %v1245_v59 = vmul.f32 %v1117_v42, %v861_v49  ;;  %v741_v51 = vmul.f32 0.7978846, %v613_v45  ;;  %v614_v54 = vadd.f32 %v486_v20, %v2307_v12  ;;  %v488_v62 = vmul.f32 %v360_v3, %v2315_v26 }
  0xc0   :  { %v1246_v9 = vmul.f32 %v1118_v46, %v862_v48  ;;  %v866_v33 = vmul.f32 0.5, %v2267_v17  ;;  %v615_v29 = vadd.f32 %v487_v13, %v2311_v8  ;;  %v489_v4 = vmul.f32 %v361_v19, %v2320_v25  ;;  %v2350_v48 = vld [vmem:[#allocation2 + $0x2a8] sm:$0xff] }
  0xc1   :  { %v1597_v58 = vpop.eup %1596  ;;  %1373 = vst [vmem:[#allocation5 + $0x230] sm:$0xff] %v1245_v59  ;;  %1608 = vtanh.f32 %v741_v51  ;;  %v742_v16 = vmul.f32 0.7978846, %v614_v54  ;;  %v616_v41 = vadd.f32 %v488_v62, %v2315_v26  ;;  %v234_v56 = vmul.f32 0.044715, %v2336_v27 }
  0xc2   :  { %v1599_v57 = vpop.eup %1598  ;;  %1374 = vst [vmem:[#allocation5 + $0x238] sm:$0xff] %v1246_v9  ;;  %v1119_v61 = vadd.f32 1.0, %v1597_v58  ;;  %v867_v37 = vmul.f32 0.5, %v2281_v30  ;;  %v743_v31 = vmul.f32 0.7978846, %v615_v29  ;;  %v617_v17 = vadd.f32 %v489_v4, %v2320_v25  ;;  %v2385_v9 = vld [vmem:[#allocation2 + $0x2d0] sm:$0xff] }
  0xc3   :  { %v1601_v15 = vpop.eup %1600  ;;  %v1120_v49 = vadd.f32 1.0, %v1599_v57  ;;  %1610 = vtanh.f32 %v742_v16  ;;  %v744_v43 = vmul.f32 0.7978846, %v616_v41  ;;  %v362_v39 = vmul.f32 %v234_v56, %v2336_v27 }
  0xc4   :  { %v1603_v53 = vpop.eup %1602  ;;  %v1247_v5 = vmul.f32 %v1119_v61, %v863_v28  ;;  %v1121_v14 = vadd.f32 1.0, %v1601_v15  ;;  %1612 = vtanh.f32 %v743_v31  ;;  %v745_v32 = vmul.f32 0.7978846, %v617_v17  ;;  %v2357_v28 = vld [vmem:[#allocation2 + $0x2b8] sm:$0xff] }
  0xc5   :  { %v1248_v21 = vmul.f32 %v1120_v49, %v864_v2  ;;  %v1122_v30 = vadd.f32 1.0, %v1603_v53  ;;  %1614 = vtanh.f32 %v744_v43  ;;  %v490_v60 = vmul.f32 %v362_v39, %v2336_v27  ;;  %v2362_v2 = vld [vmem:[#allocation2 + $0x2c0] sm:$0xff] }
  0xc6   :  { %1375 = vst [vmem:[#allocation5 + $0x240] sm:$0xff] %v1247_v5  ;;  %v1249_v52 = vmul.f32 %v1121_v14, %v865_v1  ;;  %v868_v47 = vmul.f32 0.5, %v2295_v55  ;;  %1616 = vtanh.f32 %v745_v32  ;;  %v235_v22 = vmul.f32 0.044715, %v2348_v63 }
  0xc7   :  { %v1605_v50 = vpop.eup %1604  ;;  %1376 = vst [vmem:[#allocation5 + $0x248] sm:$0xff] %v1248_v21  ;;  %v1250_v18 = vmul.f32 %v1122_v30, %v866_v33  ;;  %v869_v0 = vmul.f32 0.5, %v2302_v35  ;;  %v618_v23 = vadd.f32 %v490_v60, %v2336_v27  ;;  %v236_v44 = vmul.f32 0.044715, %v2350_v48  ;;  %v2394_v21 = vld [vmem:[#allocation2 + $0x2d8] sm:$0xff] }
  0xc8   :  { %1377 = vst [vmem:[#allocation5 + $0x250] sm:$0xff] %v1249_v52  ;;  %v1123_v34 = vadd.f32 1.0, %v1605_v50  ;;  %v870_v55 = vmul.f32 0.5, %v2307_v12  ;;  %v363_v11 = vmul.f32 %v235_v22, %v2348_v63  ;;  %v237_v10 = vmul.f32 0.044715, %v2353_v24  ;;  %v2373_v12 = vld [vmem:[#allocation2 + $0x2c8] sm:$0xff] }
  0xc9   :  { %1378 = vst [vmem:[#allocation5 + $0x258] sm:$0xff] %v1250_v18  ;;  %v871_v6 = vmul.f32 0.5, %v2311_v8  ;;  %v746_v1 = vmul.f32 0.7978846, %v618_v23  ;;  %v364_v35 = vmul.f32 %v236_v44, %v2350_v48  ;;  %v238_v36 = vmul.f32 0.044715, %v2357_v28 }
  0xca   :  { %v1251_v38 = vmul.f32 %v1123_v34, %v867_v37  ;;  %v491_v40 = vmul.f32 %v363_v11, %v2348_v63  ;;  %v365_v7 = vmul.f32 %v237_v10, %v2353_v24  ;;  %v239_v42 = vmul.f32 0.044715, %v2362_v2  ;;  %v2397_v22 = vld [vmem:[#allocation2 + $0x2e0] sm:$0xff]  ;;  %v2400_v23 = vld [vmem:[#allocation2 + $0x2e8] sm:$0xff] }
  0xcb   :  { %v1607_v45 = vpop.eup %1606  ;;  %v872_v20 = vmul.f32 0.5, %v2315_v26  ;;  %1618 = vtanh.f32 %v746_v1  ;;  %v492_v8 = vmul.f32 %v364_v35, %v2350_v48  ;;  %v366_v3 = vmul.f32 %v238_v36, %v2357_v28 }
  0xcc   :  { %1379 = vst [vmem:[#allocation5 + $0x260] sm:$0xff] %v1251_v38  ;;  %v1124_v46 = vadd.f32 1.0, %v1607_v45  ;;  %v619_v13 = vadd.f32 %v491_v40, %v2348_v63  ;;  %v493_v19 = vmul.f32 %v365_v7, %v2353_v24  ;;  %v367_v59 = vmul.f32 %v239_v42, %v2362_v2  ;;  %v2412_v42 = vld [vmem:[#allocation2 + $0x2f8] sm:$0xff] }
  0xcd   :  { %v873_v51 = vmul.f32 0.5, %v2320_v25  ;;  %v620_v54 = vadd.f32 %v492_v8, %v2350_v48  ;;  %v494_v62 = vmul.f32 %v366_v3, %v2357_v28  ;;  %v240_v26 = vmul.f32 0.044715, %v2373_v12 }
  0xce   :  { %v1609_v33 = vpop.eup %1608  ;;  %v1252_v29 = vmul.f32 %v1124_v46, %v868_v47  ;;  %v747_v4 = vmul.f32 0.7978846, %v619_v13  ;;  %v621_v58 = vadd.f32 %v493_v19, %v2353_v24  ;;  %v495_v16 = vmul.f32 %v367_v59, %v2362_v2 }
  0xcf   :  { %v1125_v41 = vadd.f32 1.0, %v1609_v33  ;;  %v748_v56 = vmul.f32 0.7978846, %v620_v54  ;;  %v622_v57 = vadd.f32 %v494_v62, %v2357_v28  ;;  %v368_v25 = vmul.f32 %v240_v26, %v2373_v12 }
  0xd0   :  { %v1611_v61 = vpop.eup %1610  ;;  %1380 = vst [vmem:[#allocation5 + $0x268] sm:$0xff] %v1252_v29  ;;  %1620 = vtanh.f32 %v747_v4  ;;  %v749_v37 = vmul.f32 0.7978846, %v621_v58  ;;  %v623_v31 = vadd.f32 %v495_v16, %v2362_v2  ;;  %v241_v17 = vmul.f32 0.044715, %v2385_v9 }
  0xd1   :  { %v1613_v15 = vpop.eup %1612  ;;  %v1253_v49 = vmul.f32 %v1125_v41, %v869_v0  ;;  %v1126_v43 = vadd.f32 1.0, %v1611_v61  ;;  %1622 = vtanh.f32 %v748_v56  ;;  %v750_v39 = vmul.f32 0.7978846, %v622_v57 }
  0xd2   :  { %v1615_v53 = vpop.eup %1614  ;;  %v1127_v5 = vadd.f32 1.0, %v1613_v15  ;;  %1624 = vtanh.f32 %v749_v37  ;;  %v751_v14 = vmul.f32 0.7978846, %v623_v31  ;;  %v496_v32 = vmul.f32 %v368_v25, %v2373_v12 }
  0xd3   :  { %v1617_v30 = vpop.eup %1616  ;;  %1381 = vst [vmem:[#allocation5 + $0x270] sm:$0xff] %v1253_v49  ;;  %v1254_v60 = vmul.f32 %v1126_v43, %v870_v55  ;;  %v1128_v52 = vadd.f32 1.0, %v1615_v53  ;;  %1626 = vtanh.f32 %v750_v39  ;;  %v369_v47 = vmul.f32 %v241_v17, %v2385_v9  ;;  %v2404_v55 = vld [vmem:[#allocation2 + $0x2f0] sm:$0xff] }
  0xd4   :  { %v1255_v50 = vmul.f32 %v1127_v5, %v871_v6  ;;  %v1129_v18 = vadd.f32 1.0, %v1617_v30  ;;  %1628 = vtanh.f32 %v751_v14  ;;  %v624_v0 = vadd.f32 %v496_v32, %v2373_v12  ;;  %v2437_v32 = vld [vmem:[#allocation2 + $0x308] sm:$0xff] }
  0xd5   :  { %1382 = vst [vmem:[#allocation5 + $0x278] sm:$0xff] %v1254_v60  ;;  %v1256_v44 = vmul.f32 %v1128_v52, %v872_v20  ;;  %v497_v34 = vmul.f32 %v369_v47, %v2385_v9  ;;  %v242_v11 = vmul.f32 0.044715, %v2394_v21  ;;  %v874_v1 = vmul.f32 0.5, %v2336_v27 }
  0xd6   :  { %1383 = vst [vmem:[#allocation5 + $0x280] sm:$0xff] %v1255_v50  ;;  %v1257_v10 = vmul.f32 %v1129_v18, %v873_v51  ;;  %v752_v35 = vmul.f32 0.7978846, %v624_v0  ;;  %v243_v6 = vmul.f32 0.044715, %v2397_v22  ;;  %v875_v36 = vmul.f32 0.5, %v2348_v63 }
  0xd7   :  { %1384 = vst [vmem:[#allocation5 + $0x288] sm:$0xff] %v1256_v44  ;;  %v625_v38 = vadd.f32 %v497_v34, %v2385_v9  ;;  %v370_v40 = vmul.f32 %v242_v11, %v2394_v21  ;;  %v244_v7 = vmul.f32 0.044715, %v2400_v23  ;;  %v876_v20 = vmul.f32 0.5, %v2350_v48  ;;  %v2423_v48 = vld [vmem:[#allocation2 + $0x300] sm:$0xff]  ;;  %v2440_v50 = vld [vmem:[#allocation2 + $0x310] sm:$0xff] }
  0xd8   :  { %v1619_v45 = vpop.eup %1618  ;;  %1385 = vst [vmem:[#allocation5 + $0x290] sm:$0xff] %v1257_v10  ;;  %1630 = vtanh.f32 %v752_v35  ;;  %v371_v27 = vmul.f32 %v243_v6, %v2397_v22  ;;  %v245_v8 = vmul.f32 0.044715, %v2404_v55  ;;  %v877_v19 = vmul.f32 0.5, %v2353_v24  ;;  %v2443_v34 = vld [vmem:[#allocation2 + $0x318] sm:$0xff]  ;;  %v2447_v6 = vld [vmem:[#allocation2 + $0x320] sm:$0xff] }
  0xd9   :  { %v1130_v3 = vadd.f32 1.0, %v1619_v45  ;;  %v753_v46 = vmul.f32 0.7978846, %v625_v38  ;;  %v498_v63 = vmul.f32 %v370_v40, %v2394_v21  ;;  %v372_v13 = vmul.f32 %v244_v7, %v2400_v23  ;;  %v2452_v45 = vld [vmem:[#allocation2 + $0x328] sm:$0xff] }
  0xda   :  { %v499_v59 = vmul.f32 %v371_v27, %v2397_v22  ;;  %v373_v51 = vmul.f32 %v245_v8, %v2404_v55  ;;  %v246_v54 = vmul.f32 0.044715, %v2412_v42  ;;  %v878_v29 = vmul.f32 0.5, %v2357_v28 }
  0xdb   :  { %v1258_v62 = vmul.f32 %v1130_v3, %v874_v1  ;;  %1632 = vtanh.f32 %v753_v46  ;;  %v626_v26 = vadd.f32 %v498_v63, %v2394_v21  ;;  %v500_v33 = vmul.f32 %v372_v13, %v2400_v23 }
  0xdc   :  { %v627_v4 = vadd.f32 %v499_v59, %v2397_v22  ;;  %v501_v24 = vmul.f32 %v373_v51, %v2404_v55  ;;  %v374_v58 = vmul.f32 %v246_v54, %v2412_v42  ;;  %v879_v41 = vmul.f32 0.5, %v2362_v2  ;;  %v2463_v51 = vld [vmem:[#allocation2 + $0x330] sm:$0xff] }
  0xdd   :  { %v1621_v16 = vpop.eup %1620  ;;  %1386 = vst [vmem:[#allocation5 + $0x298] sm:$0xff] %v1258_v62  ;;  %v754_v56 = vmul.f32 0.7978846, %v626_v26  ;;  %v628_v57 = vadd.f32 %v500_v33, %v2400_v23  ;;  %v247_v25 = vmul.f32 0.044715, %v2423_v48  ;;  %v880_v10 = vmul.f32 0.5, %v2373_v12 }
  0xde   :  { %v1623_v61 = vpop.eup %1622  ;;  %v1131_v37 = vadd.f32 1.0, %v1621_v16  ;;  %v755_v31 = vmul.f32 0.7978846, %v627_v4  ;;  %v629_v28 = vadd.f32 %v501_v24, %v2404_v55  ;;  %v502_v17 = vmul.f32 %v374_v58, %v2412_v42 }
  0xdf   :  { %v1625_v15 = vpop.eup %1624  ;;  %v1132_v49 = vadd.f32 1.0, %v1623_v61  ;;  %1634 = vtanh.f32 %v754_v56  ;;  %v756_v43 = vmul.f32 0.7978846, %v628_v57  ;;  %v375_v39 = vmul.f32 %v247_v25, %v2423_v48 }
  0xe0   :  { %v1627_v53 = vpop.eup %1626  ;;  %v1259_v2 = vmul.f32 %v1131_v37, %v875_v36  ;;  %v1133_v5 = vadd.f32 1.0, %v1625_v15  ;;  %1636 = vtanh.f32 %v755_v31  ;;  %v757_v14 = vmul.f32 0.7978846, %v629_v28 }
  0xe1   :  { %v1629_v30 = vpop.eup %1628  ;;  %v1260_v60 = vmul.f32 %v1132_v49, %v876_v20  ;;  %v1134_v52 = vadd.f32 1.0, %v1627_v53  ;;  %1638 = vtanh.f32 %v756_v43  ;;  %v630_v47 = vadd.f32 %v502_v17, %v2412_v42 }
  0xe2   :  { %1387 = vst [vmem:[#allocation5 + $0x2a0] sm:$0xff] %v1259_v2  ;;  %v1261_v18 = vmul.f32 %v1133_v5, %v877_v19  ;;  %v1135_v0 = vadd.f32 1.0, %v1629_v30  ;;  %1640 = vtanh.f32 %v757_v14  ;;  %v503_v44 = vmul.f32 %v375_v39, %v2423_v48 }
  0xe3   :  { %1388 = vst [vmem:[#allocation5 + $0x2a8] sm:$0xff] %v1260_v60  ;;  %v1262_v11 = vmul.f32 %v1134_v52, %v878_v29  ;;  %v758_v1 = vmul.f32 0.7978846, %v630_v47  ;;  %v248_v35 = vmul.f32 0.044715, %v2437_v32  ;;  %v881_v38 = vmul.f32 0.5, %v2385_v9 }
  0xe4   :  { %1389 = vst [vmem:[#allocation5 + $0x2b0] sm:$0xff] %v1261_v18  ;;  %v1263_v36 = vmul.f32 %v1135_v0, %v879_v41  ;;  %v631_v40 = vadd.f32 %v503_v44, %v2423_v48  ;;  %v249_v7 = vmul.f32 0.044715, %v2440_v50  ;;  %v882_v27 = vmul.f32 0.5, %v2394_v21  ;;  %v2481_v60 = vld [vmem:[#allocation2 + $0x338] sm:$0xff]  ;;  %v2483_v0 = vld [vmem:[#allocation2 + $0x340] sm:$0xff] }
  0xe5   :  { %v1631_v20 = vpop.eup %1630  ;;  %1390 = vst [vmem:[#allocation5 + $0x2b8] sm:$0xff] %v1262_v11  ;;  %1642 = vtanh.f32 %v758_v1  ;;  %v376_v12 = vmul.f32 %v248_v35, %v2437_v32  ;;  %v250_v8 = vmul.f32 0.044715, %v2443_v34  ;;  %v251_v63 = vmul.f32 0.044715, %v2447_v6  ;;  %v2486_v1 = vld [vmem:[#allocation2 + $0x348] sm:$0xff] }
  0xe6   :  { %1391 = vst [vmem:[#allocation5 + $0x2c0] sm:$0xff] %v1263_v36  ;;  %v1136_v3 = vadd.f32 1.0, %v1631_v20  ;;  %v759_v46 = vmul.f32 0.7978846, %v631_v40  ;;  %v377_v9 = vmul.f32 %v249_v7, %v2440_v50  ;;  %v883_v13 = vmul.f32 0.5, %v2397_v22  ;;  %v2490_v40 = vld [vmem:[#allocation2 + $0x350] sm:$0xff] }
  0xe7   :  { %v504_v19 = vmul.f32 %v376_v12, %v2437_v32  ;;  %v378_v59 = vmul.f32 %v250_v8, %v2443_v34  ;;  %v252_v21 = vmul.f32 0.044715, %v2452_v45  ;;  %v379_v33 = vmul.f32 %v251_v63, %v2447_v6 }
  0xe8   :  { %v1633_v54 = vpop.eup %1632  ;;  %v1264_v62 = vmul.f32 %v1136_v3, %v880_v10  ;;  %1644 = vtanh.f32 %v759_v46  ;;  %v505_v26 = vmul.f32 %v377_v9, %v2440_v50  ;;  %v884_v58 = vmul.f32 0.5, %v2400_v23  ;;  %v2494_v3 = vld [vmem:[#allocation2 + $0x358] sm:$0xff] }
  0xe9   :  { %v1137_v29 = vadd.f32 1.0, %v1633_v54  ;;  %v632_v4 = vadd.f32 %v504_v19, %v2437_v32  ;;  %v506_v22 = vmul.f32 %v378_v59, %v2443_v34  ;;  %v380_v24 = vmul.f32 %v252_v21, %v2452_v45  ;;  %v2502_v59 = vld [vmem:[#allocation2 + $0x360] sm:$0xff] }
  0xea   :  { %1392 = vst [vmem:[#allocation5 + $0x2c8] sm:$0xff] %v1264_v62  ;;  %v633_v16 = vadd.f32 %v505_v26, %v2440_v50  ;;  %v507_v41 = vmul.f32 %v379_v33, %v2447_v6  ;;  %v253_v56 = vmul.f32 0.044715, %v2463_v51  ;;  %v885_v28 = vmul.f32 0.5, %v2404_v55 }
  0xeb   :  { %v1265_v57 = vmul.f32 %v1137_v29, %v881_v38  ;;  %v760_v25 = vmul.f32 0.7978846, %v632_v4  ;;  %v634_v61 = vadd.f32 %v506_v22, %v2443_v34  ;;  %v508_v37 = vmul.f32 %v380_v24, %v2452_v45 }
  0xec   :  { %v1635_v31 = vpop.eup %1634  ;;  %v761_v17 = vmul.f32 0.7978846, %v633_v16  ;;  %v635_v15 = vadd.f32 %v507_v41, %v2447_v6  ;;  %v381_v23 = vmul.f32 %v253_v56, %v2463_v51  ;;  %v886_v36 = vmul.f32 0.5, %v2412_v42  ;;  %v2514_v41 = vld [vmem:[#allocation2 + $0x368] sm:$0xff] }
  0xed   :  { %v1637_v49 = vpop.eup %1636  ;;  %1393 = vst [vmem:[#allocation5 + $0x2d0] sm:$0xff] %v1265_v57  ;;  %v1138_v43 = vadd.f32 1.0, %v1635_v31  ;;  %1646 = vtanh.f32 %v760_v25  ;;  %v762_v39 = vmul.f32 0.7978846, %v634_v61  ;;  %v636_v53 = vadd.f32 %v508_v37, %v2452_v45 }
  0xee   :  { %v1639_v2 = vpop.eup %1638  ;;  %v1139_v5 = vadd.f32 1.0, %v1637_v49  ;;  %1648 = vtanh.f32 %v761_v17  ;;  %v763_v14 = vmul.f32 0.7978846, %v635_v15  ;;  %v509_v30 = vmul.f32 %v381_v23, %v2463_v51 }
  0xef   :  { %v1641_v55 = vpop.eup %1640  ;;  %v1266_v52 = vmul.f32 %v1138_v43, %v882_v27  ;;  %v1140_v47 = vadd.f32 1.0, %v1639_v2  ;;  %1650 = vtanh.f32 %v762_v39  ;;  %v764_v18 = vmul.f32 0.7978846, %v636_v53 }
  0xf0   :  { %v1267_v44 = vmul.f32 %v1139_v5, %v883_v13  ;;  %v1141_v11 = vadd.f32 1.0, %v1641_v55  ;;  %1652 = vtanh.f32 %v763_v14  ;;  %v637_v10 = vadd.f32 %v509_v30, %v2463_v51 }
  0xf1   :  { %1394 = vst [vmem:[#allocation5 + $0x2d8] sm:$0xff] %v1266_v52  ;;  %v1268_v35 = vmul.f32 %v1140_v47, %v884_v58  ;;  %1654 = vtanh.f32 %v764_v18  ;;  %v254_v38 = vmul.f32 0.044715, %v2481_v60  ;;  %v887_v27 = vmul.f32 0.5, %v2423_v48 }
  0xf2   :  { %v1643_v7 = vpop.eup %1642  ;;  %1395 = vst [vmem:[#allocation5 + $0x2e0] sm:$0xff] %v1267_v44  ;;  %v1269_v20 = vmul.f32 %v1141_v11, %v885_v28  ;;  %v765_v12 = vmul.f32 0.7978846, %v637_v10  ;;  %v255_v8 = vmul.f32 0.044715, %v2483_v0  ;;  %v888_v9 = vmul.f32 0.5, %v2437_v32 }
  0xf3   :  { %1396 = vst [vmem:[#allocation5 + $0x2e8] sm:$0xff] %v1268_v35  ;;  %v1142_v46 = vadd.f32 1.0, %v1643_v7  ;;  %v382_v42 = vmul.f32 %v254_v38, %v2481_v60  ;;  %v256_v63 = vmul.f32 0.044715, %v2486_v1  ;;  %v889_v13 = vmul.f32 0.5, %v2440_v50  ;;  %v2527_v44 = vld [vmem:[#allocation2 + $0x370] sm:$0xff] }
  0xf4   :  { %1397 = vst [vmem:[#allocation5 + $0x2f0] sm:$0xff] %v1269_v20  ;;  %1656 = vtanh.f32 %v765_v12  ;;  %v383_v19 = vmul.f32 %v255_v8, %v2483_v0  ;;  %v257_v48 = vmul.f32 0.044715, %v2490_v40  ;;  %v258_v26 = vmul.f32 0.044715, %v2494_v3  ;;  %v2530_v38 = vld [vmem:[#allocation2 + $0x378] sm:$0xff] }
  0xf5   :  { %v1645_v21 = vpop.eup %1644  ;;  %v1270_v54 = vmul.f32 %v1142_v46, %v886_v36  ;;  %v510_v62 = vmul.f32 %v382_v42, %v2481_v60  ;;  %v384_v32 = vmul.f32 %v256_v63, %v2486_v1  ;;  %v890_v29 = vmul.f32 0.5, %v2443_v34  ;;  %v2533_v12 = vld [vmem:[#allocation2 + $0x380] sm:$0xff]  ;;  %v2537_v63 = vld [vmem:[#allocation2 + $0x388] sm:$0xff] }
  0xf6   :  { %v1143_v33 = vadd.f32 1.0, %v1645_v21  ;;  %v511_v50 = vmul.f32 %v383_v19, %v2483_v0  ;;  %v385_v4 = vmul.f32 %v257_v48, %v2490_v40  ;;  %v386_v58 = vmul.f32 %v258_v26, %v2494_v3  ;;  %v2544_v26 = vld [vmem:[#allocation2 + $0x390] sm:$0xff] }
  0xf7   :  { %1398 = vst [vmem:[#allocation5 + $0x2f8] sm:$0xff] %v1270_v54  ;;  %v638_v22 = vadd.f32 %v510_v62, %v2481_v60  ;;  %v512_v24 = vmul.f32 %v384_v32, %v2486_v1  ;;  %v259_v16 = vmul.f32 0.044715, %v2502_v59  ;;  %v891_v57 = vmul.f32 0.5, %v2447_v6 }
  0xf8   :  { %v1271_v56 = vmul.f32 %v1143_v33, %v887_v27  ;;  %v639_v34 = vadd.f32 %v511_v50, %v2483_v0  ;;  %v513_v25 = vmul.f32 %v385_v4, %v2490_v40  ;;  %v514_v31 = vmul.f32 %v386_v58, %v2494_v3  ;;  %v2550_v4 = vld [vmem:[#allocation2 + $0x398] sm:$0xff] }
  0xf9   :  { %v766_v61 = vmul.f32 0.7978846, %v638_v22  ;;  %v640_v37 = vadd.f32 %v512_v24, %v2486_v1  ;;  %v387_v28 = vmul.f32 %v259_v16, %v2502_v59  ;;  %v892_v15 = vmul.f32 0.5, %v2452_v45 }
  0xfa   :  { %v1647_v17 = vpop.eup %1646  ;;  %1399 = vst [vmem:[#allocation5 + $0x300] sm:$0xff] %v1271_v56  ;;  %v767_v23 = vmul.f32 0.7978846, %v639_v34  ;;  %v641_v49 = vadd.f32 %v513_v25, %v2490_v40  ;;  %v260_v6 = vmul.f32 0.044715, %v2514_v41  ;;  %v642_v2 = vadd.f32 %v514_v31, %v2494_v3 }
  0xfb   :  { %v1649_v43 = vpop.eup %1648  ;;  %v1144_v39 = vadd.f32 1.0, %v1647_v17  ;;  %1658 = vtanh.f32 %v766_v61  ;;  %v768_v53 = vmul.f32 0.7978846, %v640_v37  ;;  %v515_v55 = vmul.f32 %v387_v28, %v2502_v59 }
  0xfc   :  { %v1651_v5 = vpop.eup %1650  ;;  %v1145_v14 = vadd.f32 1.0, %v1649_v43  ;;  %1660 = vtanh.f32 %v767_v23  ;;  %v769_v30 = vmul.f32 0.7978846, %v641_v49  ;;  %v770_v18 = vmul.f32 0.7978846, %v642_v2 }
  0xfd   :  { %v1653_v52 = vpop.eup %1652  ;;  %v1272_v47 = vmul.f32 %v1144_v39, %v888_v9  ;;  %v1146_v45 = vadd.f32 1.0, %v1651_v5  ;;  %1662 = vtanh.f32 %v768_v53  ;;  %v643_v36 = vadd.f32 %v515_v55, %v2502_v59 }
  0xfe   :  { %v1655_v11 = vpop.eup %1654  ;;  %v1273_v10 = vmul.f32 %v1145_v14, %v889_v13  ;;  %v1147_v35 = vadd.f32 1.0, %v1653_v52  ;;  %1664 = vtanh.f32 %v769_v30  ;;  %v388_v27 = vmul.f32 %v260_v6, %v2514_v41 }
  0xff   :  { %1400 = vst [vmem:[#allocation5 + $0x308] sm:$0xff] %v1272_v47  ;;  %v1274_v7 = vmul.f32 %v1146_v45, %v890_v29  ;;  %v1148_v20 = vadd.f32 1.0, %v1655_v11  ;;  %1666 = vtanh.f32 %v770_v18  ;;  %v893_v46 = vmul.f32 0.5, %v2463_v51  ;;  %v2571_v11 = vld [vmem:[#allocation2 + $0x3a0] sm:$0xff] }
 0x100   :  { %1401 = vst [vmem:[#allocation5 + $0x310] sm:$0xff] %v1273_v10  ;;  %v1275_v8 = vmul.f32 %v1147_v35, %v891_v57  ;;  %v771_v9 = vmul.f32 0.7978846, %v643_v36  ;;  %v261_v42 = vmul.f32 0.044715, %v2527_v44  ;;  %v894_v48 = vmul.f32 0.5, %v2481_v60 }
 0x101   :  { %v1657_v13 = vpop.eup %1656  ;;  %1402 = vst [vmem:[#allocation5 + $0x318] sm:$0xff] %v1274_v7  ;;  %v1276_v19 = vmul.f32 %v1148_v20, %v892_v15  ;;  %v516_v21 = vmul.f32 %v388_v27, %v2514_v41  ;;  %v262_v54 = vmul.f32 0.044715, %v2530_v38  ;;  %v263_v51 = vmul.f32 0.044715, %v2533_v12  ;;  %v2574_v20 = vld [vmem:[#allocation2 + $0x3a8] sm:$0xff] }
 0x102   :  { %1403 = vst [vmem:[#allocation5 + $0x320] sm:$0xff] %v1275_v8  ;;  %v1149_v62 = vadd.f32 1.0, %v1657_v13  ;;  %1668 = vtanh.f32 %v771_v9  ;;  %v389_v32 = vmul.f32 %v261_v42, %v2527_v44  ;;  %v895_v33 = vmul.f32 0.5, %v2483_v0  ;;  %v2577_v9 = vld [vmem:[#allocation2 + $0x3b0] sm:$0xff] }
 0x103   :  { %1404 = vst [vmem:[#allocation5 + $0x328] sm:$0xff] %v1276_v19  ;;  %v644_v29 = vadd.f32 %v516_v21, %v2514_v41  ;;  %v390_v60 = vmul.f32 %v262_v54, %v2530_v38  ;;  %v264_v50 = vmul.f32 0.044715, %v2537_v63  ;;  %v896_v24 = vmul.f32 0.5, %v2486_v1  ;;  %v2581_v21 = vld [vmem:[#allocation2 + $0x3b8] sm:$0xff] }
 0x104   :  { %v1277_v22 = vmul.f32 %v1149_v62, %v893_v46  ;;  %v517_v58 = vmul.f32 %v389_v32, %v2527_v44  ;;  %v391_v16 = vmul.f32 %v263_v51, %v2533_v12  ;;  %v265_v34 = vmul.f32 0.044715, %v2544_v26 }
 0x105   :  { %v772_v56 = vmul.f32 0.7978846, %v644_v29  ;;  %v518_v57 = vmul.f32 %v390_v60, %v2530_v38  ;;  %v392_v0 = vmul.f32 %v264_v50, %v2537_v63  ;;  %v897_v25 = vmul.f32 0.5, %v2490_v40  ;;  %v2587_v50 = vld [vmem:[#allocation2 + $0x3c0] sm:$0xff] }
 0x106   :  { %1405 = vst [vmem:[#allocation5 + $0x330] sm:$0xff] %v1277_v22  ;;  %v645_v61 = vadd.f32 %v517_v58, %v2527_v44  ;;  %v519_v37 = vmul.f32 %v391_v16, %v2533_v12  ;;  %v266_v1 = vmul.f32 0.044715, %v2550_v4  ;;  %v393_v17 = vmul.f32 %v265_v34, %v2544_v26  ;;  %v2592_v58 = vld [vmem:[#allocation2 + $0x3c8] sm:$0xff] }
 0x107   :  { %1670 = vtanh.f32 %v772_v56  ;;  %v646_v31 = vadd.f32 %v518_v57, %v2530_v38  ;;  %v520_v28 = vmul.f32 %v392_v0, %v2537_v63  ;;  %v898_v23 = vmul.f32 0.5, %v2494_v3 }
 0x108   :  { %v1659_v15 = vpop.eup %1658  ;;  %v773_v49 = vmul.f32 0.7978846, %v645_v61  ;;  %v647_v6 = vadd.f32 %v519_v37, %v2533_v12  ;;  %v394_v40 = vmul.f32 %v266_v1, %v2550_v4  ;;  %v521_v5 = vmul.f32 %v393_v17, %v2544_v26  ;;  %v2601_v37 = vld [vmem:[#allocation2 + $0x3d0] sm:$0xff] }
 0x109   :  { %v1661_v43 = vpop.eup %1660  ;;  %v1150_v39 = vadd.f32 1.0, %v1659_v15  ;;  %v774_v53 = vmul.f32 0.7978846, %v646_v31  ;;  %v648_v2 = vadd.f32 %v520_v28, %v2537_v63  ;;  %v899_v13 = vmul.f32 0.5, %v2502_v59 }
 0x10a   :  { %v1663_v14 = vpop.eup %1662  ;;  %v1151_v30 = vadd.f32 1.0, %v1661_v43  ;;  %1672 = vtanh.f32 %v773_v49  ;;  %v775_v55 = vmul.f32 0.7978846, %v647_v6  ;;  %v522_v52 = vmul.f32 %v394_v40, %v2550_v4 }
 0x10b   :  { %v1665_v47 = vpop.eup %1664  ;;  %v1278_v3 = vmul.f32 %v1150_v39, %v894_v48  ;;  %v1152_v45 = vadd.f32 1.0, %v1663_v14  ;;  %1674 = vtanh.f32 %v774_v53  ;;  %v776_v18 = vmul.f32 0.7978846, %v648_v2 }
 0x10c   :  { %v1667_v10 = vpop.eup %1666  ;;  %v1279_v35 = vmul.f32 %v1151_v30, %v895_v33  ;;  %v1153_v36 = vadd.f32 1.0, %v1665_v47  ;;  %1676 = vtanh.f32 %v775_v55  ;;  %v649_v7 = vadd.f32 %v521_v5, %v2544_v26 }
 0x10d   :  { %1406 = vst [vmem:[#allocation5 + $0x338] sm:$0xff] %v1278_v3  ;;  %v1280_v27 = vmul.f32 %v1152_v45, %v896_v24  ;;  %v1154_v8 = vadd.f32 1.0, %v1667_v10  ;;  %1678 = vtanh.f32 %v776_v18  ;;  %v650_v46 = vadd.f32 %v522_v52, %v2550_v4 }
 0x10e   :  { %1407 = vst [vmem:[#allocation5 + $0x340] sm:$0xff] %v1279_v35  ;;  %v1281_v42 = vmul.f32 %v1153_v36, %v897_v25  ;;  %v777_v19 = vmul.f32 0.7978846, %v649_v7  ;;  %v267_v48 = vmul.f32 0.044715, %v2571_v11  ;;  %v900_v32 = vmul.f32 0.5, %v2514_v41 }
 0x10f   :  { %v1669_v54 = vpop.eup %1668  ;;  %1408 = vst [vmem:[#allocation5 + $0x348] sm:$0xff] %v1280_v27  ;;  %v1282_v62 = vmul.f32 %v1154_v8, %v898_v23  ;;  %v778_v51 = vmul.f32 0.7978846, %v650_v46  ;;  %v268_v33 = vmul.f32 0.044715, %v2574_v20  ;;  %v901_v22 = vmul.f32 0.5, %v2527_v44 }
 0x110   :  { %1409 = vst [vmem:[#allocation5 + $0x350] sm:$0xff] %v1281_v42  ;;  %v1155_v29 = vadd.f32 1.0, %v1669_v54  ;;  %1680 = vtanh.f32 %v777_v19  ;;  %v395_v60 = vmul.f32 %v267_v48, %v2571_v11  ;;  %v269_v59 = vmul.f32 0.044715, %v2577_v9  ;;  %v2618_v8 = vld [vmem:[#allocation2 + $0x3d8] sm:$0xff]  ;;  %v2620_v19 = vld [vmem:[#allocation2 + $0x3e0] sm:$0xff] }
 0x111   :  { %1410 = vst [vmem:[#allocation5 + $0x358] sm:$0xff] %v1282_v62  ;;  %1682 = vtanh.f32 %v778_v51  ;;  %v396_v24 = vmul.f32 %v268_v33, %v2574_v20  ;;  %v270_v41 = vmul.f32 0.044715, %v2581_v21  ;;  %v902_v56 = vmul.f32 0.5, %v2530_v38  ;;  %v2624_v51 = vld [vmem:[#allocation2 + $0x3e8] sm:$0xff] }
 0x112   :  { %v1283_v16 = vmul.f32 %v1155_v29, %v899_v13  ;;  %v523_v57 = vmul.f32 %v395_v60, %v2571_v11  ;;  %v397_v0 = vmul.f32 %v269_v59, %v2577_v9  ;;  %v903_v34 = vmul.f32 0.5, %v2533_v12 }
 0x113   :  { %v524_v25 = vmul.f32 %v396_v24, %v2574_v20  ;;  %v398_v44 = vmul.f32 %v270_v41, %v2581_v21  ;;  %v271_v61 = vmul.f32 0.044715, %v2587_v50  ;;  %v904_v31 = vmul.f32 0.5, %v2537_v63 }
 0x114   :  { %v1671_v1 = vpop.eup %1670  ;;  %1411 = vst [vmem:[#allocation5 + $0x360] sm:$0xff] %v1283_v16  ;;  %v651_v38 = vadd.f32 %v523_v57, %v2571_v11  ;;  %v525_v28 = vmul.f32 %v397_v0, %v2577_v9  ;;  %v272_v17 = vmul.f32 0.044715, %v2592_v58  ;;  %v273_v63 = vmul.f32 0.044715, %v2601_v37  ;;  %v2630_v16 = vld [vmem:[#allocation2 + $0x3f0] sm:$0xff] }
 0x115   :  { %v1156_v15 = vadd.f32 1.0, %v1671_v1  ;;  %v652_v12 = vadd.f32 %v524_v25, %v2574_v20  ;;  %v526_v23 = vmul.f32 %v398_v44, %v2581_v21  ;;  %v399_v49 = vmul.f32 %v271_v61, %v2587_v50 }
 0x116   :  { %v779_v6 = vmul.f32 0.7978846, %v651_v38  ;;  %v653_v40 = vadd.f32 %v525_v28, %v2577_v9  ;;  %v400_v43 = vmul.f32 %v272_v17, %v2592_v58  ;;  %v905_v54 = vmul.f32 0.5, %v2544_v26 }
 0x117   :  { %v1673_v39 = vpop.eup %1672  ;;  %v1284_v53 = vmul.f32 %v1156_v15, %v900_v32  ;;  %v780_v2 = vmul.f32 0.7978846, %v652_v12  ;;  %v654_v5 = vadd.f32 %v526_v23, %v2581_v21  ;;  %v527_v14 = vmul.f32 %v399_v49, %v2587_v50 }
 0x118   :  { %v1675_v30 = vpop.eup %1674  ;;  %v1157_v55 = vadd.f32 1.0, %v1673_v39  ;;  %1684 = vtanh.f32 %v779_v6  ;;  %v781_v52 = vmul.f32 0.7978846, %v653_v40  ;;  %v528_v47 = vmul.f32 %v400_v43, %v2592_v58 }
 0x119   :  { %v1677_v3 = vpop.eup %1676  ;;  %1412 = vst [vmem:[#allocation5 + $0x368] sm:$0xff] %v1284_v53  ;;  %v1158_v45 = vadd.f32 1.0, %v1675_v30  ;;  %1686 = vtanh.f32 %v780_v2  ;;  %v782_v18 = vmul.f32 0.7978846, %v654_v5  ;;  %v655_v10 = vadd.f32 %v527_v14, %v2587_v50 }
 0x11a   :  { %v1679_v35 = vpop.eup %1678  ;;  %v1285_v36 = vmul.f32 %v1157_v55, %v901_v22  ;;  %v1159_v7 = vadd.f32 1.0, %v1677_v3  ;;  %1688 = vtanh.f32 %v781_v52  ;;  %v656_v27 = vadd.f32 %v528_v47, %v2592_v58 }
 0x11b   :  { %v1286_v46 = vmul.f32 %v1158_v45, %v902_v56  ;;  %v1160_v42 = vadd.f32 1.0, %v1679_v35  ;;  %1690 = vtanh.f32 %v782_v18  ;;  %v783_v13 = vmul.f32 0.7978846, %v655_v10 }
 0x11c   :  { %1413 = vst [vmem:[#allocation5 + $0x370] sm:$0xff] %v1285_v36  ;;  %v1287_v48 = vmul.f32 %v1159_v7, %v903_v34  ;;  %v784_v62 = vmul.f32 0.7978846, %v656_v27  ;;  %v401_v32 = vmul.f32 %v273_v63, %v2601_v37  ;;  %v906_v60 = vmul.f32 0.5, %v2550_v4  ;;  %v2634_v4 = vld [vmem:[#allocation2 + $0x3f8] sm:$0xff] }
 0x11d   :  { %v1681_v33 = vpop.eup %1680  ;;  %1414 = vst [vmem:[#allocation5 + $0x378] sm:$0xff] %v1286_v46  ;;  %v1288_v29 = vmul.f32 %v1160_v42, %v904_v31  ;;  %1692 = vtanh.f32 %v783_v13  ;;  %v274_v59 = vmul.f32 0.044715, %v2618_v8  ;;  %v275_v26 = vmul.f32 0.044715, %v2620_v19 }
 0x11e   :  { %v1683_v22 = vpop.eup %1682  ;;  %1415 = vst [vmem:[#allocation5 + $0x380] sm:$0xff] %v1287_v48  ;;  %v1161_v24 = vadd.f32 1.0, %v1681_v33  ;;  %1694 = vtanh.f32 %v784_v62  ;;  %v529_v41 = vmul.f32 %v401_v32, %v2601_v37  ;;  %v276_v0 = vmul.f32 0.044715, %v2624_v51 }
 0x11f   :  { %1416 = vst [vmem:[#allocation5 + $0x388] sm:$0xff] %v1288_v29  ;;  %v1162_v56 = vadd.f32 1.0, %v1683_v22  ;;  %v402_v57 = vmul.f32 %v274_v59, %v2618_v8  ;;  %v403_v44 = vmul.f32 %v275_v26, %v2620_v19  ;;  %v277_v38 = vmul.f32 0.044715, %v2630_v16 }
 0x120   :  { %v1289_v34 = vmul.f32 %v1161_v24, %v905_v54  ;;  %v657_v25 = vadd.f32 %v529_v41, %v2601_v37  ;;  %v404_v31 = vmul.f32 %v276_v0, %v2624_v51  ;;  %v907_v28 = vmul.f32 0.5, %v2571_v11 }
 0x121   :  { %v1290_v61 = vmul.f32 %v1162_v56, %v906_v60  ;;  %v530_v1 = vmul.f32 %v402_v57, %v2618_v8  ;;  %v531_v15 = vmul.f32 %v403_v44, %v2620_v19  ;;  %v278_v12 = vmul.f32 0.044715, %v2634_v4 }
 0x122   :  { %1417 = vst [vmem:[#allocation5 + $0x390] sm:$0xff] %v1289_v34  ;;  %v785_v17 = vmul.f32 0.7978846, %v657_v25  ;;  %v908_v23 = vmul.f32 0.5, %v2574_v20  ;;  %v532_v6 = vmul.f32 %v404_v31, %v2624_v51  ;;  %v405_v40 = vmul.f32 %v277_v38, %v2630_v16 }
 0x123   :  { %1418 = vst [vmem:[#allocation5 + $0x398] sm:$0xff] %v1290_v61  ;;  %v658_v49 = vadd.f32 %v530_v1, %v2618_v8  ;;  %v909_v43 = vmul.f32 0.5, %v2577_v9  ;;  %v659_v63 = vadd.f32 %v531_v15, %v2620_v19  ;;  %v406_v11 = vmul.f32 %v278_v12, %v2634_v4 }
 0x124   :  { %1696 = vtanh.f32 %v785_v17  ;;  %v910_v53 = vmul.f32 0.5, %v2581_v21  ;;  %v660_v5 = vadd.f32 %v532_v6, %v2624_v51  ;;  %v533_v20 = vmul.f32 %v405_v40, %v2630_v16 }
 0x125   :  { %v1685_v39 = vpop.eup %1684  ;;  %v786_v2 = vmul.f32 0.7978846, %v658_v49  ;;  %v911_v55 = vmul.f32 0.5, %v2587_v50  ;;  %v787_v52 = vmul.f32 0.7978846, %v659_v63  ;;  %v534_v9 = vmul.f32 %v406_v11, %v2634_v4 }
 0x126   :  { %v1687_v14 = vpop.eup %1686  ;;  %v1163_v30 = vadd.f32 1.0, %v1685_v39  ;;  %v788_v45 = vmul.f32 0.7978846, %v660_v5  ;;  %v661_v18 = vadd.f32 %v533_v20, %v2630_v16  ;;  %v912_v13 = vmul.f32 0.5, %v2592_v58 }
 0x127   :  { %v1689_v47 = vpop.eup %1688  ;;  %v1164_v3 = vadd.f32 1.0, %v1687_v14  ;;  %1698 = vtanh.f32 %v786_v2  ;;  %v662_v36 = vadd.f32 %v534_v9, %v2634_v4  ;;  %v913_v59 = vmul.f32 0.5, %v2601_v37 }
 0x128   :  { %v1691_v10 = vpop.eup %1690  ;;  %v1291_v21 = vmul.f32 %v1163_v30, %v907_v28  ;;  %v1165_v35 = vadd.f32 1.0, %v1689_v47  ;;  %1700 = vtanh.f32 %v787_v52  ;;  %v789_v46 = vmul.f32 0.7978846, %v661_v18 }
 0x129   :  { %v1292_v7 = vmul.f32 %v1164_v3, %v908_v23  ;;  %v1166_v27 = vadd.f32 1.0, %v1691_v10  ;;  %1702 = vtanh.f32 %v788_v45  ;;  %v790_v48 = vmul.f32 0.7978846, %v662_v36 }
 0x12a   :  { %v1693_v50 = vpop.eup %1692  ;;  %1419 = vst [vmem:[#allocation5 + $0x3a0] sm:$0xff] %v1291_v21  ;;  %v1293_v42 = vmul.f32 %v1165_v35, %v909_v43  ;;  %1704 = vtanh.f32 %v789_v46  ;;  %v914_v58 = vmul.f32 0.5, %v2618_v8  ;;  %v915_v56 = vmul.f32 0.5, %v2620_v19 }
 0x12b   :  { %v1695_v54 = vpop.eup %1694  ;;  %1420 = vst [vmem:[#allocation5 + $0x3a8] sm:$0xff] %v1292_v7  ;;  %v1294_v62 = vmul.f32 %v1166_v27, %v910_v53  ;;  %v1167_v32 = vadd.f32 1.0, %v1693_v50  ;;  %1706 = vtanh.f32 %v790_v48  ;;  %v916_v34 = vmul.f32 0.5, %v2624_v51 }
 0x12c   :  { %1421 = vst [vmem:[#allocation5 + $0x3b0] sm:$0xff] %v1293_v42  ;;  %v1168_v33 = vadd.f32 1.0, %v1695_v54  ;;  %v917_v31 = vmul.f32 0.5, %v2630_v16  ;;  %v918_v28 = vmul.f32 0.5, %v2634_v4 }
 0x12d   :  { %1422 = vst [vmem:[#allocation5 + $0x3b8] sm:$0xff] %v1294_v62  ;;  %v1295_v29 = vmul.f32 %v1167_v32, %v911_v55 }
 0x12e   :  { %v1296_v60 = vmul.f32 %v1168_v33, %v912_v13 }
 0x12f   :  { %1423 = vst [vmem:[#allocation5 + $0x3c0] sm:$0xff] %v1295_v29 }
 0x130   :  { %1424 = vst [vmem:[#allocation5 + $0x3c8] sm:$0xff] %v1296_v60 }
 0x131   :  { %v1697_v22 = vpop.eup %1696 }
 0x132   :  { %v1169_v24 = vadd.f32 1.0, %v1697_v22 }
 0x134   :  { %v1699_v41 = vpop.eup %1698  ;;  %v1297_v26 = vmul.f32 %v1169_v24, %v913_v59 }
 0x135   :  { %v1701_v57 = vpop.eup %1700  ;;  %v1170_v0 = vadd.f32 1.0, %v1699_v41 }
 0x136   :  { %v1703_v25 = vpop.eup %1702  ;;  %1425 = vst [vmem:[#allocation5 + $0x3d0] sm:$0xff] %v1297_v26  ;;  %v1171_v44 = vadd.f32 1.0, %v1701_v57 }
 0x137   :  { %v1298_v61 = vmul.f32 %v1170_v0, %v914_v58  ;;  %v1172_v1 = vadd.f32 1.0, %v1703_v25  ;;  %v1705_v37 = vpop.eup %1704 }
 0x138   :  { %v1299_v38 = vmul.f32 %v1171_v44, %v915_v56  ;;  %v1707_v8 = vpop.eup %1706  ;;  %v1173_v15 = vadd.f32 1.0, %v1705_v37 }
 0x139   :  { %1426 = vst [vmem:[#allocation5 + $0x3d8] sm:$0xff] %v1298_v61  ;;  %v1300_v17 = vmul.f32 %v1172_v1, %v916_v34  ;;  %v1174_v19 = vadd.f32 1.0, %v1707_v8 }
 0x13a   :  { %1427 = vst [vmem:[#allocation5 + $0x3e0] sm:$0xff] %v1299_v38  ;;  %v1301_v51 = vmul.f32 %v1173_v15, %v917_v31 }
 0x13b   :  { %1428 = vst [vmem:[#allocation5 + $0x3e8] sm:$0xff] %v1300_v17  ;;  %v1302_v12 = vmul.f32 %v1174_v19, %v918_v28 }
 0x13c   :  { %1429 = vst [vmem:[#allocation5 + $0x3f0] sm:$0xff] %v1301_v51 }
 0x13d   :  { %1430 = vst [vmem:[#allocation5 + $0x3f8] sm:$0xff] %v1302_v12 }
 0x13e   :  { %1739 = shalt.err (!%p1736_p9)
}
 0x13f   :  { %1442 = dma.vmem_to_hbm [thread:$0]  %s1437_s13, 16384, %s2672_s1, [#allocation4], %s1753_s9, %s1753_s9, %s1754_s10  }
 0x140   :  { %1750 = dma.done.wait [#allocation4], 16384  }
 0x141   :  { %1751 = vsyncadd [#allocation4], 4294950912 }
 0x142   :  { %1446 = vsyncpa [#allocation3], 1 }
 0x143   :  { %1447 = vsyncpa [#allocation4], 1 }

</bundles_post_ra>
